<compile_context>
chip_gen: v7x
topology: tpu7x:2x2x1
jax: 0.10.0
libtpu: 0.0.40
codegen_flags: <defaults>
</compile_context>

<pallas_src>
import math
from functools import partial
from typing import NamedTuple

import jax
import jax.numpy as jnp
from jax import lax
from jax.experimental import pallas as pl
from jax.experimental.pallas import tpu as pltpu


# ------------------------------ static config -------------------------------

class _Cfg(NamedTuple):
    C_in: int
    C_out: int
    kh: int
    kw: int
    H: int
    W: int
    ph: int
    pw: int
    eps: float


class _Geo(NamedTuple):
    Ho: int
    Wo: int
    qh: int
    qw: int
    Hf: int
    Wf: int
    Nu: int
    Nv: int
    lead_u: int
    lead_v: int
    qoff: int
    poff: int
    Fu: int
    Fv: int


def _lcm(a, b):
    return a * b // math.gcd(a, b)


def _geometry(cfg: _Cfg) -> _Geo:
    Ho = cfg.H + 2 * cfg.ph - cfg.kh + 1
    Wo = cfg.W + 2 * cfg.pw - cfg.kw + 1
    qh = cfg.kh - 1 - cfg.ph                 # conv_T padding
    qw = cfg.kw - 1 - cfg.pw
    Hp, Wp = cfg.H + 2 * cfg.ph, cfg.W + 2 * cfg.pw        # padded v grid
    Hop, Wop = Ho + 2 * qh, Wo + 2 * qw                    # padded u grid
    Wf_base = max(Wp, Wop)
    # Lane-dense padding: choose Wf so Nu = Ho*Wf and Nv = H*Wf are multiples
    # of 128 (unmasked stores / lane-dense matmul N).  If that would waste too
    # much space, settle for a sublane-friendly multiple of 8.  The column
    # masks built from this same Wf keep correctness either way.
    req = _lcm(128 // math.gcd(128, cfg.H), 128 // math.gcd(128, Ho))
    Wf = -(-Wf_base // req) * req
    if Wf > max(2 * Wf_base, Wf_base + 32):
        Wf = -(-Wf_base // 8) * 8
    Hf = max(Hp, Hop) + 1       # one slack row so the last shifted tap slice stays in-bounds
    Nu = Ho * Wf
    Nv = cfg.H * Wf
    qoff0 = qh * Wf + qw        # flat offset of u interior within the u grid
    poff0 = cfg.ph * Wf + cfg.pw
    lead_u = (-qoff0) % 128     # leading slack so the interior write is 128-aligned
    lead_v = (-poff0) % 128
    qoff = lead_u + qoff0
    poff = lead_v + poff0
    Fu = lead_u + Hf * Wf
    Fv = lead_v + Hf * Wf
    # row-wrap lanes of the wide conv outputs must land in masked padding cols
    assert cfg.pw + cfg.W <= Wf and qw + Wo <= Wf
    return _Geo(Ho, Wo, qh, qw, Hf, Wf, Nu, Nv, lead_u, lead_v, qoff, poff, Fu, Fv)


def _full_spec(shape):
    # whole-array block, constant block index -> loaded once / VMEM-resident
    return pl.BlockSpec(shape, lambda i: (0,) * len(shape))


# ------------------------------ Pallas kernel --------------------------------

def _make_kernel(cfg: _Cfg, n_iter: int):
    C_in, C_out, kh, kw = cfg.C_in, cfg.C_out, cfg.kh, cfg.kw
    g = _geometry(cfg)
    Wf, Nu, Nv = g.Wf, g.Nu, g.Nv
    qoff, poff = g.qoff, g.poff
    lead_u, lead_v = g.lead_u, g.lead_v
    eps2 = float(cfg.eps) ** 2
    taps = [(i, j) for i in range(kh) for j in range(kw)]

    def kernel(w_mat_ref, wt_mat_ref, uf0_ref, vf0_ref, mask_u_ref, mask_v_ref,
               w_flat_ref, uf_ref, vf_ref, w_scaled_ref):

        # "wide" conv as a sum over kernel taps: one small MXU matmul per tap
        # on a contiguous flat-shifted slice of the zero-padded frame.
        def conv_wide(frame_ref, wmat_ref, c_src, lead, n_cols):
            acc = None
            for t, (i, j) in enumerate(taps):
                w_t = wmat_ref[:, t * c_src:(t + 1) * c_src]          # (C_dst, C_src)
                off = lead + i * Wf + j
                x_t = frame_ref[:, off:off + n_cols]                  # (C_src, n_cols)
                y = jnp.dot(w_t, x_t, preferred_element_type=jnp.float32)
                acc = y if acc is None else acc + y
            return acc

        # ---- init: copy stored u / v frames into the VMEM-resident state ----
        uf_ref[...] = uf0_ref[...]
        vf_ref[...] = vf0_ref[...]
        mask_u = mask_u_ref[...]
        mask_v = mask_v_ref[...]

        # ---- one power iteration (PyTorch order: u first, then v) ----------
        def one_iteration():
            wide_u = conv_wide(vf_ref, w_mat_ref, C_in, lead_v, Nu) * mask_u
            # F.normalize(dim=None): x / max(||x||, eps) == x * rsqrt(max(s, eps^2))
            inv_u = lax.rsqrt(jnp.maximum(jnp.sum(wide_u * wide_u), eps2))
            uf_ref[:, qoff:qoff + Nu] = wide_u * inv_u        # 128-aligned, lane-dense
            wide_v = conv_wide(uf_ref, wt_mat_ref, C_out, lead_u, Nv) * mask_v
            inv_v = lax.rsqrt(jnp.maximum(jnp.sum(wide_v * wide_v), eps2))
            vf_ref[:, poff:poff + Nv] = wide_v * inv_v

        if n_iter > 0:
            if n_iter <= 4:
                for _ in range(n_iter):
                    one_iteration()
            else:
                def body(it, carry):
                    one_iteration()
                    return carry
                lax.fori_loop(0, n_iter, body, 0)

        # ---- sigma = <u, conv(v)>;  w_scaled = w / sigma --------------------
        wv = conv_wide(vf_ref, w_mat_ref, C_in, lead_v, Nu)
        # u frame is zero at every non-interior position, so no mask is needed
        sigma = jnp.sum(uf_ref[:, qoff:qoff + Nu] * wv)
        w_scaled_ref[...] = w_flat_ref[...] * (1.0 / sigma)

    return kernel


# ------------------------------ JAX wrappers ---------------------------------

def _weight_mats(weight, cfg: _Cfg):
    C_in, C_out, kh, kw = cfg.C_in, cfg.C_out, cfg.kh, cfg.kw
    w = weight.astype(jnp.float32)
    # conv weight, tap-major columns (C_in per tap): col (i*kw+j)*C_in + c == w[o,c,i,j]
    w_mat = w.transpose(0, 2, 3, 1).reshape(C_out, kh * kw * C_in)
    # conv_T weight: spatial flip + in/out swap, tap-major columns (C_out per tap)
    wt_mat = jnp.flip(w, axis=(2, 3)).transpose(1, 2, 3, 0).reshape(C_in, kh * kw * C_out)
    w_flat = w.reshape(C_out, C_in * kh * kw)
    return w_mat, wt_mat, w_flat


def _masks(cfg: _Cfg):
    g = _geometry(cfg)
    col_u = jnp.arange(g.Nu, dtype=jnp.int32) % g.Wf
    mask_u = (col_u < g.Wo).astype(jnp.float32).reshape(1, g.Nu)
    col_v = jnp.arange(g.Nv, dtype=jnp.int32) % g.Wf
    mask_v = (col_v < cfg.W).astype(jnp.float32).reshape(1, g.Nv)
    return mask_u, mask_v


@partial(jax.jit, static_argnames=("cfg", "n_iter"))
def _run_power_method(weight, uf0, vf0, *, cfg: _Cfg, n_iter: int):
    C_in, C_out, kh, kw = cfg.C_in, cfg.C_out, cfg.kh, cfg.kw
    g = _geometry(cfg)
    K, Kt = kh * kw * C_in, kh * kw * C_out

    w_mat, wt_mat, w_flat = _weight_mats(weight, cfg)
    mask_u, mask_v = _masks(cfg)

    uf, vf, w_scaled = pl.pallas_call(
        _make_kernel(cfg, n_iter),
        out_shape=(
            jax.ShapeDtypeStruct((C_out, g.Fu), jnp.float32),            # u frame
            jax.ShapeDtypeStruct((C_in, g.Fv), jnp.float32),             # v frame
            jax.ShapeDtypeStruct((C_out, C_in * kh * kw), jnp.float32),  # w / sigma
        ),
        grid_spec=pltpu.PrefetchScalarGridSpec(
            num_scalar_prefetch=0,
            grid=(1,),                      # all iterations inside the kernel
            in_specs=[
                _full_spec((C_out, K)),
                _full_spec((C_in, Kt)),
                _full_spec((C_out, g.Fu)),
                _full_spec((C_in, g.Fv)),
                _full_spec((1, g.Nu)),
                _full_spec((1, g.Nv)),
                _full_spec((C_out, C_in * kh * kw)),
            ],
            out_specs=[
                _full_spec((C_out, g.Fu)),
                _full_spec((C_in, g.Fv)),
                _full_spec((C_out, C_in * kh * kw)),
            ],
        ),
        compiler_params=pltpu.CompilerParams(
            dimension_semantics=("arbitrary",),
        ),
    )(w_mat, wt_mat, uf0, vf0, mask_u, mask_v, w_flat)
    return uf, vf, w_scaled


# frame <-> NCHW glue (tiny, once per call; not on the per-iteration hot path)

def _embed_v_frame(v, cfg: _Cfg):
    g = _geometry(cfg)
    frame = jnp.zeros((cfg.C_in, g.Hf, g.Wf), jnp.float32)
    frame = frame.at[:, cfg.ph:cfg.ph + cfg.H, cfg.pw:cfg.pw + cfg.W].set(v[0])
    flat = frame.reshape(cfg.C_in, g.Hf * g.Wf)
    return jnp.pad(flat, ((0, 0), (g.lead_v, 0)))


def _embed_u_frame(u, cfg: _Cfg):
    g = _geometry(cfg)
    frame = jnp.zeros((cfg.C_out, g.Hf, g.Wf), jnp.float32)
    frame = frame.at[:, g.qh:g.qh + g.Ho, g.qw:g.qw + g.Wo].set(u[0])
    flat = frame.reshape(cfg.C_out, g.Hf * g.Wf)
    return jnp.pad(flat, ((0, 0), (g.lead_u, 0)))


def _extract_u(uf, cfg: _Cfg):
    g = _geometry(cfg)
    grid = uf[:, g.lead_u:].reshape(cfg.C_out, g.Hf, g.Wf)
    return grid[:, g.qh:g.qh + g.Ho, g.qw:g.qw + g.Wo][None]


def _extract_v(vf, cfg: _Cfg):
    g = _geometry(cfg)
    grid = vf[:, g.lead_v:].reshape(cfg.C_in, g.Hf, g.Wf)
    return grid[:, cfg.ph:cfg.ph + cfg.H, cfg.pw:cfg.pw + cfg.W][None]


# --------------------------- module equivalent -------------------------------

class SpectralNormConv2d:
    """JAX/Pallas equivalent of _SpectralNormConvNd specialized to Conv2d."""

    def __init__(self, weight, in_shape, n_power_iterations=1,
                 stride=(1, 1), padding=(0, 0), dilation=(1, 1),
                 eps=1e-12, key=None):
        if n_power_iterations <= 0:
            raise ValueError("Expected n_power_iterations to be positive")
        stride, padding, dilation = tuple(stride), tuple(padding), tuple(dilation)
        C_out, C_in, kh, kw = (int(s) for s in weight.shape)
        H, W = (int(s) for s in in_shape)
        ph, pw = padding
        if stride != (1, 1) or dilation != (1, 1):
            # TODO(synk): fused power-iteration kernel only implements the
            # stride=1 / dilation=1 conv and conv_T pair.
            raise NotImplementedError("stride/dilation != 1 not supported")
        if not (0 <= ph <= kh - 1 and 0 <= pw <= kw - 1):
            # TODO(synk): conv_T equivalence assumes padding <= kernel-1.
            raise NotImplementedError("padding must satisfy 0 <= p <= k-1")

        self.eps = float(eps)
        self.n_power_iterations = int(n_power_iterations)
        self.stride, self.padding, self.dilation = stride, padding, dilation
        self.cfg = _Cfg(C_in, C_out, kh, kw, H, W, ph, pw, self.eps)
        g = _geometry(self.cfg)

        if key is None:
            key = jax.random.PRNGKey(0)
        ku, kv = jax.random.split(key)
        v0 = jax.random.normal(kv, (1, C_in, H, W), jnp.float32)
        u0 = jax.random.normal(ku, (1, C_out, g.Ho, g.Wo), jnp.float32)
        # buffers mirror PyTorch: global (dim=None) L2 normalization
        self._u = u0 / jnp.maximum(jnp.sqrt(jnp.sum(u0 * u0)), self.eps)
        self._v = v0 / jnp.maximum(jnp.sqrt(jnp.sum(v0 * v0)), self.eps)
        self._uf = _embed_u_frame(self._u, self.cfg)
        self._vf = _embed_v_frame(self._v, self.cfg)

        # 100 power iterations at construction — ONE pallas_call, ONE in-kernel loop
        self._power_method(weight, 100)

    def _power_method(self, kernel, n_power_iterations):
        uf, vf, _ = _run_power_method(jnp.asarray(kernel, jnp.float32),
                                      self._uf, self._vf,
                                      cfg=self.cfg, n_iter=int(n_power_iterations))
        self._uf, self._vf = uf, vf
        self._u = _extract_u(uf, self.cfg)
        self._v = _extract_v(vf, self.cfg)

    def forward(self, kernel, training=True):
        w = jnp.asarray(kernel, jnp.float32)
        n_iter = self.n_power_iterations if training else 0
        uf, vf, w_scaled = _run_power_method(w, self._uf, self._vf,
                                             cfg=self.cfg, n_iter=n_iter)
        if training:
            self._uf, self._vf = uf, vf
            self._u = _extract_u(uf, self.cfg)
            self._v = _extract_v(vf, self.cfg)
        return w_scaled.reshape(kernel.shape)


# --------------------------------- main ---------------------------------------

if __name__ == "__main__":
    import numpy as np

    root = jax.random.PRNGKey(0)
    k_w, k_uv = jax.random.split(root)

    C_out, C_in, KH, KW = 8, 4, 3, 3
    in_shape = (16, 16)
    weight = jax.random.normal(k_w, (C_out, C_in, KH, KW), jnp.float32) * 0.2

    sn = SpectralNormConv2d(weight, in_shape, n_power_iterations=1,
                            stride=(1, 1), padding=(1, 1), dilation=(1, 1),
                            eps=1e-12, key=k_uv)

    out = sn.forward(weight, training=True)
    out = jax.block_until_ready(out)

    # sanity: sigma from the fused Pallas kernel matches XLA's conv reference
    # (computed with the SAME u, v buffers the module holds after forward)
    wv_ref = jax.lax.conv_general_dilated(
        sn._v, weight, window_strides=(1, 1), padding=((1, 1), (1, 1)),
        rhs_dilation=(1, 1), dimension_numbers=("NCHW", "OIHW", "NCHW"))
    sigma_ref = jnp.sum(sn._u * wv_ref)
    out_ref = weight / sigma_ref
    np.testing.assert_allclose(np.asarray(out), np.asarray(out_ref),
                               rtol=2e-2, atol=2e-4)

    # buffers are globally unit-norm, as in the PyTorch module
    assert abs(float(jnp.sqrt(jnp.sum(sn._u * sn._u))) - 1.0) < 1e-4
    assert abs(float(jnp.sqrt(jnp.sum(sn._v * sn._v))) - 1.0) < 1e-4

    # eval path (no power iterations) reproduces the same scaled kernel
    out_eval = jax.block_until_ready(sn.forward(weight, training=False))
    np.testing.assert_allclose(np.asarray(out_eval), np.asarray(out),
                               rtol=1e-4, atol=1e-6)

    assert out.shape == weight.shape
    assert bool(jnp.all(jnp.isfinite(out)))

    print("KERNEL_OK")
</pallas_src>

<mosaic_0001>
module attributes {stable_mosaic.version = 11 : i64} {
  func.func @kernel(%arg0: i32, %arg1: memref<8x36xf32, #tpu.memory_space<vmem>>, %arg2: memref<4x72xf32, #tpu.memory_space<vmem>>, %arg3: memref<8x559xf32, #tpu.memory_space<vmem>>, %arg4: memref<4x559xf32, #tpu.memory_space<vmem>>, %arg5: memref<1x384xf32, #tpu.memory_space<vmem>>, %arg6: memref<1x384xf32, #tpu.memory_space<vmem>>, %arg7: memref<8x36xf32, #tpu.memory_space<vmem>>, %arg8: memref<8x559xf32, #tpu.memory_space<vmem>>, %arg9: memref<4x559xf32, #tpu.memory_space<vmem>>, %arg10: memref<8x36xf32, #tpu.memory_space<vmem>>) attributes {dimension_semantics = [#tpu.dimension_semantics<arbitrary>], iteration_bounds = array<i64: 1>, scalar_prefetch = 0 : i64, scratch_operands = 0 : i64, tpu.core_type = #tpu.core_type<tc>, window_params = [{pipeline_mode = #tpu.pipeline_mode<synchronous>, transform_indices = @transform_0, window_bounds = array<i64: 8, 36>}, {pipeline_mode = #tpu.pipeline_mode<synchronous>, transform_indices = @transform_1, window_bounds = array<i64: 4, 72>}, {pipeline_mode = #tpu.pipeline_mode<synchronous>, transform_indices = @transform_2, window_bounds = array<i64: 8, 559>}, {pipeline_mode = #tpu.pipeline_mode<synchronous>, transform_indices = @transform_3, window_bounds = array<i64: 4, 559>}, {pipeline_mode = #tpu.pipeline_mode<synchronous>, transform_indices = @transform_4, window_bounds = array<i64: 1, 384>}, {pipeline_mode = #tpu.pipeline_mode<synchronous>, transform_indices = @transform_5, window_bounds = array<i64: 1, 384>}, {pipeline_mode = #tpu.pipeline_mode<synchronous>, transform_indices = @transform_6, window_bounds = array<i64: 8, 36>}, {pipeline_mode = #tpu.pipeline_mode<synchronous>, transform_indices = @transform_7, window_bounds = array<i64: 8, 559>}, {pipeline_mode = #tpu.pipeline_mode<synchronous>, transform_indices = @transform_8, window_bounds = array<i64: 4, 559>}, {pipeline_mode = #tpu.pipeline_mode<synchronous>, transform_indices = @transform_9, window_bounds = array<i64: 8, 36>}]} {
    %c0 = arith.constant 0 : index
    %c0_0 = arith.constant 0 : index
    %0 = vector.load %arg3[%c0, %c0_0] : memref<8x559xf32, #tpu.memory_space<vmem>>, vector<8x559xf32>
    %c0_1 = arith.constant 0 : index
    %c0_2 = arith.constant 0 : index
    %1 = vector.load %arg8[%c0_1, %c0_2] : memref<8x559xf32, #tpu.memory_space<vmem>>, vector<8x559xf32>
    tpu.vector_store %arg8[%c0_1, %c0_2], %0 {strides = array<i32>} : memref<8x559xf32, #tpu.memory_space<vmem>>, vector<8x559xf32>,
    %c0_3 = arith.constant 0 : index
    %c0_4 = arith.constant 0 : index
    %2 = vector.load %arg4[%c0_3, %c0_4] : memref<4x559xf32, #tpu.memory_space<vmem>>, vector<4x559xf32>
    %c0_5 = arith.constant 0 : index
    %c0_6 = arith.constant 0 : index
    %3 = vector.load %arg9[%c0_5, %c0_6] : memref<4x559xf32, #tpu.memory_space<vmem>>, vector<4x559xf32>
    tpu.vector_store %arg9[%c0_5, %c0_6], %2 {strides = array<i32>} : memref<4x559xf32, #tpu.memory_space<vmem>>, vector<4x559xf32>,
    %c0_7 = arith.constant 0 : index
    %c0_8 = arith.constant 0 : index
    %4 = vector.load %arg5[%c0_7, %c0_8] : memref<1x384xf32, #tpu.memory_space<vmem>>, vector<1x384xf32>
    %c0_9 = arith.constant 0 : index
    %c0_10 = arith.constant 0 : index
    %5 = vector.load %arg6[%c0_9, %c0_10] : memref<1x384xf32, #tpu.memory_space<vmem>>, vector<1x384xf32>
    %c0_i32 = arith.constant 0 : i32
    %c100_i32 = arith.constant 100 : i32
    %6 = arith.addi %c0_i32, %c100_i32 : i32
    %c1_i32 = arith.constant 1 : i32
    scf.for %arg11 = %c0_i32 to %6 step %c1_i32  : i32 {
      %c0_46 = arith.constant 0 : index
      %c0_47 = arith.constant 0 : index
      %53 = vector.load %arg1[%c0_46, %c0_47] : memref<8x36xf32, #tpu.memory_space<vmem>>, vector<8x4xf32>
      %c0_48 = arith.constant 0 : index
      %c103_49 = arith.constant 103 : index
      %54 = vector.load %arg9[%c0_48, %c103_49] : memref<4x559xf32, #tpu.memory_space<vmem>>, vector<4x384xf32>
      %cst_50 = arith.constant dense<0.000000e+00> : vector<8x384xf32>
      %55 = tpu.matmul %53, %54, %cst_50 {dimension_numbers = #tpu.dot_dimension_numbers<[1], [0], [0], [1], [0, 0, 1, 1], [], []>} : vector<8x4xf32>, vector<4x384xf32>, vector<8x384xf32> -> vector<8x384xf32>
      %c0_51 = arith.constant 0 : index
      %c4_52 = arith.constant 4 : index
      %56 = vector.load %arg1[%c0_51, %c4_52] : memref<8x36xf32, #tpu.memory_space<vmem>>, vector<8x4xf32>
      %c0_53 = arith.constant 0 : index
      %c104_54 = arith.constant 104 : index
      %57 = vector.load %arg9[%c0_53, %c104_54] : memref<4x559xf32, #tpu.memory_space<vmem>>, vector<4x384xf32>
      %cst_55 = arith.constant dense<0.000000e+00> : vector<8x384xf32>
      %58 = tpu.matmul %56, %57, %cst_55 {dimension_numbers = #tpu.dot_dimension_numbers<[1], [0], [0], [1], [0, 0, 1, 1], [], []>} : vector<8x4xf32>, vector<4x384xf32>, vector<8x384xf32> -> vector<8x384xf32>
      %59 = arith.addf %55, %58 : vector<8x384xf32>
      %c0_56 = arith.constant 0 : index
      %c8_57 = arith.constant 8 : index
      %60 = vector.load %arg1[%c0_56, %c8_57] : memref<8x36xf32, #tpu.memory_space<vmem>>, vector<8x4xf32>
      %c0_58 = arith.constant 0 : index
      %c105_59 = arith.constant 105 : index
      %61 = vector.load %arg9[%c0_58, %c105_59] : memref<4x559xf32, #tpu.memory_space<vmem>>, vector<4x384xf32>
      %cst_60 = arith.constant dense<0.000000e+00> : vector<8x384xf32>
      %62 = tpu.matmul %60, %61, %cst_60 {dimension_numbers = #tpu.dot_dimension_numbers<[1], [0], [0], [1], [0, 0, 1, 1], [], []>} : vector<8x4xf32>, vector<4x384xf32>, vector<8x384xf32> -> vector<8x384xf32>
      %63 = arith.addf %59, %62 : vector<8x384xf32>
      %c0_61 = arith.constant 0 : index
      %c12_62 = arith.constant 12 : index
      %64 = vector.load %arg1[%c0_61, %c12_62] : memref<8x36xf32, #tpu.memory_space<vmem>>, vector<8x4xf32>
      %c0_63 = arith.constant 0 : index
      %c127_64 = arith.constant 127 : index
      %65 = vector.load %arg9[%c0_63, %c127_64] : memref<4x559xf32, #tpu.memory_space<vmem>>, vector<4x384xf32>
      %cst_65 = arith.constant dense<0.000000e+00> : vector<8x384xf32>
      %66 = tpu.matmul %64, %65, %cst_65 {dimension_numbers = #tpu.dot_dimension_numbers<[1], [0], [0], [1], [0, 0, 1, 1], [], []>} : vector<8x4xf32>, vector<4x384xf32>, vector<8x384xf32> -> vector<8x384xf32>
      %67 = arith.addf %63, %66 : vector<8x384xf32>
      %c0_66 = arith.constant 0 : index
      %c16_67 = arith.constant 16 : index
      %68 = vector.load %arg1[%c0_66, %c16_67] : memref<8x36xf32, #tpu.memory_space<vmem>>, vector<8x4xf32>
      %c0_68 = arith.constant 0 : index
      %c128_69 = arith.constant 128 : index
      %69 = vector.load %arg9[%c0_68, %c128_69] : memref<4x559xf32, #tpu.memory_space<vmem>>, vector<4x384xf32>
      %cst_70 = arith.constant dense<0.000000e+00> : vector<8x384xf32>
      %70 = tpu.matmul %68, %69, %cst_70 {dimension_numbers = #tpu.dot_dimension_numbers<[1], [0], [0], [1], [0, 0, 1, 1], [], []>} : vector<8x4xf32>, vector<4x384xf32>, vector<8x384xf32> -> vector<8x384xf32>
      %71 = arith.addf %67, %70 : vector<8x384xf32>
      %c0_71 = arith.constant 0 : index
      %c20_72 = arith.constant 20 : index
      %72 = vector.load %arg1[%c0_71, %c20_72] : memref<8x36xf32, #tpu.memory_space<vmem>>, vector<8x4xf32>
      %c0_73 = arith.constant 0 : index
      %c129_74 = arith.constant 129 : index
      %73 = vector.load %arg9[%c0_73, %c129_74] : memref<4x559xf32, #tpu.memory_space<vmem>>, vector<4x384xf32>
      %cst_75 = arith.constant dense<0.000000e+00> : vector<8x384xf32>
      %74 = tpu.matmul %72, %73, %cst_75 {dimension_numbers = #tpu.dot_dimension_numbers<[1], [0], [0], [1], [0, 0, 1, 1], [], []>} : vector<8x4xf32>, vector<4x384xf32>, vector<8x384xf32> -> vector<8x384xf32>
      %75 = arith.addf %71, %74 : vector<8x384xf32>
      %c0_76 = arith.constant 0 : index
      %c24_77 = arith.constant 24 : index
      %76 = vector.load %arg1[%c0_76, %c24_77] : memref<8x36xf32, #tpu.memory_space<vmem>>, vector<8x4xf32>
      %c0_78 = arith.constant 0 : index
      %c151_79 = arith.constant 151 : index
      %77 = vector.load %arg9[%c0_78, %c151_79] : memref<4x559xf32, #tpu.memory_space<vmem>>, vector<4x384xf32>
      %cst_80 = arith.constant dense<0.000000e+00> : vector<8x384xf32>
      %78 = tpu.matmul %76, %77, %cst_80 {dimension_numbers = #tpu.dot_dimension_numbers<[1], [0], [0], [1], [0, 0, 1, 1], [], []>} : vector<8x4xf32>, vector<4x384xf32>, vector<8x384xf32> -> vector<8x384xf32>
      %79 = arith.addf %75, %78 : vector<8x384xf32>
      %c0_81 = arith.constant 0 : index
      %c28_82 = arith.constant 28 : index
      %80 = vector.load %arg1[%c0_81, %c28_82] : memref<8x36xf32, #tpu.memory_space<vmem>>, vector<8x4xf32>
      %c0_83 = arith.constant 0 : index
      %c152_84 = arith.constant 152 : index
      %81 = vector.load %arg9[%c0_83, %c152_84] : memref<4x559xf32, #tpu.memory_space<vmem>>, vector<4x384xf32>
      %cst_85 = arith.constant dense<0.000000e+00> : vector<8x384xf32>
      %82 = tpu.matmul %80, %81, %cst_85 {dimension_numbers = #tpu.dot_dimension_numbers<[1], [0], [0], [1], [0, 0, 1, 1], [], []>} : vector<8x4xf32>, vector<4x384xf32>, vector<8x384xf32> -> vector<8x384xf32>
      %83 = arith.addf %79, %82 : vector<8x384xf32>
      %c0_86 = arith.constant 0 : index
      %c32_87 = arith.constant 32 : index
      %84 = vector.load %arg1[%c0_86, %c32_87] : memref<8x36xf32, #tpu.memory_space<vmem>>, vector<8x4xf32>
      %c0_88 = arith.constant 0 : index
      %c153_89 = arith.constant 153 : index
      %85 = vector.load %arg9[%c0_88, %c153_89] : memref<4x559xf32, #tpu.memory_space<vmem>>, vector<4x384xf32>
      %cst_90 = arith.constant dense<0.000000e+00> : vector<8x384xf32>
      %86 = tpu.matmul %84, %85, %cst_90 {dimension_numbers = #tpu.dot_dimension_numbers<[1], [0], [0], [1], [0, 0, 1, 1], [], []>} : vector<8x4xf32>, vector<4x384xf32>, vector<8x384xf32> -> vector<8x384xf32>
      %87 = arith.addf %83, %86 : vector<8x384xf32>
      %88 = vector.broadcast %4 : vector<1x384xf32> to vector<8x384xf32>
      %89 = arith.mulf %87, %88 : vector<8x384xf32>
      %90 = arith.mulf %89, %89 : vector<8x384xf32>
      %91 = vector.shape_cast %90 : vector<8x384xf32> to vector<1x8x384xf32>
      %cst_91 = arith.constant dense<0.000000e+00> : vector<1xf32>
      %92 = vector.multi_reduction <add>, %91, %cst_91 [1, 2] : vector<1x8x384xf32> to vector<1xf32>
      %93 = vector.shape_cast %92 : vector<1xf32> to vector<1x1x1xf32>
      %94 = vector.extract %93[0, 0, 0] : f32 from vector<1x1x1xf32>
      %cst_92 = arith.constant 1.000000e-24 : f32
      %95 = arith.maximumf %94, %cst_92 : f32
      %96 = math.rsqrt %95 : f32
      %97 = vector.broadcast %96 : f32 to vector<8x384xf32>
      %98 = arith.mulf %89, %97 : vector<8x384xf32>
      %c0_93 = arith.constant 0 : index
      %c128_94 = arith.constant 128 : index
      %99 = vector.load %arg8[%c0_93, %c128_94] : memref<8x559xf32, #tpu.memory_space<vmem>>, vector<8x384xf32>
      tpu.vector_store %arg8[%c0_93, %c128_94], %98 {strides = array<i32>} : memref<8x559xf32, #tpu.memory_space<vmem>>, vector<8x384xf32>,
      %c0_95 = arith.constant 0 : index
      %c0_96 = arith.constant 0 : index
      %100 = vector.load %arg2[%c0_95, %c0_96] : memref<4x72xf32, #tpu.memory_space<vmem>>, vector<4x8xf32>
      %c0_97 = arith.constant 0 : index
      %c103_98 = arith.constant 103 : index
      %101 = vector.load %arg8[%c0_97, %c103_98] : memref<8x559xf32, #tpu.memory_space<vmem>>, vector<8x384xf32>
      %cst_99 = arith.constant dense<0.000000e+00> : vector<4x384xf32>
      %102 = tpu.matmul %100, %101, %cst_99 {dimension_numbers = #tpu.dot_dimension_numbers<[1], [0], [0], [1], [0, 0, 1, 1], [], []>} : vector<4x8xf32>, vector<8x384xf32>, vector<4x384xf32> -> vector<4x384xf32>
      %c0_100 = arith.constant 0 : index
      %c8_101 = arith.constant 8 : index
      %103 = vector.load %arg2[%c0_100, %c8_101] : memref<4x72xf32, #tpu.memory_space<vmem>>, vector<4x8xf32>
      %c0_102 = arith.constant 0 : index
      %c104_103 = arith.constant 104 : index
      %104 = vector.load %arg8[%c0_102, %c104_103] : memref<8x559xf32, #tpu.memory_space<vmem>>, vector<8x384xf32>
      %cst_104 = arith.constant dense<0.000000e+00> : vector<4x384xf32>
      %105 = tpu.matmul %103, %104, %cst_104 {dimension_numbers = #tpu.dot_dimension_numbers<[1], [0], [0], [1], [0, 0, 1, 1], [], []>} : vector<4x8xf32>, vector<8x384xf32>, vector<4x384xf32> -> vector<4x384xf32>
      %106 = arith.addf %102, %105 : vector<4x384xf32>
      %c0_105 = arith.constant 0 : index
      %c16_106 = arith.constant 16 : index
      %107 = vector.load %arg2[%c0_105, %c16_106] : memref<4x72xf32, #tpu.memory_space<vmem>>, vector<4x8xf32>
      %c0_107 = arith.constant 0 : index
      %c105_108 = arith.constant 105 : index
      %108 = vector.load %arg8[%c0_107, %c105_108] : memref<8x559xf32, #tpu.memory_space<vmem>>, vector<8x384xf32>
      %cst_109 = arith.constant dense<0.000000e+00> : vector<4x384xf32>
      %109 = tpu.matmul %107, %108, %cst_109 {dimension_numbers = #tpu.dot_dimension_numbers<[1], [0], [0], [1], [0, 0, 1, 1], [], []>} : vector<4x8xf32>, vector<8x384xf32>, vector<4x384xf32> -> vector<4x384xf32>
      %110 = arith.addf %106, %109 : vector<4x384xf32>
      %c0_110 = arith.constant 0 : index
      %c24_111 = arith.constant 24 : index
      %111 = vector.load %arg2[%c0_110, %c24_111] : memref<4x72xf32, #tpu.memory_space<vmem>>, vector<4x8xf32>
      %c0_112 = arith.constant 0 : index
      %c127_113 = arith.constant 127 : index
      %112 = vector.load %arg8[%c0_112, %c127_113] : memref<8x559xf32, #tpu.memory_space<vmem>>, vector<8x384xf32>
      %cst_114 = arith.constant dense<0.000000e+00> : vector<4x384xf32>
      %113 = tpu.matmul %111, %112, %cst_114 {dimension_numbers = #tpu.dot_dimension_numbers<[1], [0], [0], [1], [0, 0, 1, 1], [], []>} : vector<4x8xf32>, vector<8x384xf32>, vector<4x384xf32> -> vector<4x384xf32>
      %114 = arith.addf %110, %113 : vector<4x384xf32>
      %c0_115 = arith.constant 0 : index
      %c32_116 = arith.constant 32 : index
      %115 = vector.load %arg2[%c0_115, %c32_116] : memref<4x72xf32, #tpu.memory_space<vmem>>, vector<4x8xf32>
      %c0_117 = arith.constant 0 : index
      %c128_118 = arith.constant 128 : index
      %116 = vector.load %arg8[%c0_117, %c128_118] : memref<8x559xf32, #tpu.memory_space<vmem>>, vector<8x384xf32>
      %cst_119 = arith.constant dense<0.000000e+00> : vector<4x384xf32>
      %117 = tpu.matmul %115, %116, %cst_119 {dimension_numbers = #tpu.dot_dimension_numbers<[1], [0], [0], [1], [0, 0, 1, 1], [], []>} : vector<4x8xf32>, vector<8x384xf32>, vector<4x384xf32> -> vector<4x384xf32>
      %118 = arith.addf %114, %117 : vector<4x384xf32>
      %c0_120 = arith.constant 0 : index
      %c40 = arith.constant 40 : index
      %119 = vector.load %arg2[%c0_120, %c40] : memref<4x72xf32, #tpu.memory_space<vmem>>, vector<4x8xf32>
      %c0_121 = arith.constant 0 : index
      %c129_122 = arith.constant 129 : index
      %120 = vector.load %arg8[%c0_121, %c129_122] : memref<8x559xf32, #tpu.memory_space<vmem>>, vector<8x384xf32>
      %cst_123 = arith.constant dense<0.000000e+00> : vector<4x384xf32>
      %121 = tpu.matmul %119, %120, %cst_123 {dimension_numbers = #tpu.dot_dimension_numbers<[1], [0], [0], [1], [0, 0, 1, 1], [], []>} : vector<4x8xf32>, vector<8x384xf32>, vector<4x384xf32> -> vector<4x384xf32>
      %122 = arith.addf %118, %121 : vector<4x384xf32>
      %c0_124 = arith.constant 0 : index
      %c48 = arith.constant 48 : index
      %123 = vector.load %arg2[%c0_124, %c48] : memref<4x72xf32, #tpu.memory_space<vmem>>, vector<4x8xf32>
      %c0_125 = arith.constant 0 : index
      %c151_126 = arith.constant 151 : index
      %124 = vector.load %arg8[%c0_125, %c151_126] : memref<8x559xf32, #tpu.memory_space<vmem>>, vector<8x384xf32>
      %cst_127 = arith.constant dense<0.000000e+00> : vector<4x384xf32>
      %125 = tpu.matmul %123, %124, %cst_127 {dimension_numbers = #tpu.dot_dimension_numbers<[1], [0], [0], [1], [0, 0, 1, 1], [], []>} : vector<4x8xf32>, vector<8x384xf32>, vector<4x384xf32> -> vector<4x384xf32>
      %126 = arith.addf %122, %125 : vector<4x384xf32>
      %c0_128 = arith.constant 0 : index
      %c56 = arith.constant 56 : index
      %127 = vector.load %arg2[%c0_128, %c56] : memref<4x72xf32, #tpu.memory_space<vmem>>, vector<4x8xf32>
      %c0_129 = arith.constant 0 : index
      %c152_130 = arith.constant 152 : index
      %128 = vector.load %arg8[%c0_129, %c152_130] : memref<8x559xf32, #tpu.memory_space<vmem>>, vector<8x384xf32>
      %cst_131 = arith.constant dense<0.000000e+00> : vector<4x384xf32>
      %129 = tpu.matmul %127, %128, %cst_131 {dimension_numbers = #tpu.dot_dimension_numbers<[1], [0], [0], [1], [0, 0, 1, 1], [], []>} : vector<4x8xf32>, vector<8x384xf32>, vector<4x384xf32> -> vector<4x384xf32>
      %130 = arith.addf %126, %129 : vector<4x384xf32>
      %c0_132 = arith.constant 0 : index
      %c64 = arith.constant 64 : index
      %131 = vector.load %arg2[%c0_132, %c64] : memref<4x72xf32, #tpu.memory_space<vmem>>, vector<4x8xf32>
      %c0_133 = arith.constant 0 : index
      %c153_134 = arith.constant 153 : index
      %132 = vector.load %arg8[%c0_133, %c153_134] : memref<8x559xf32, #tpu.memory_space<vmem>>, vector<8x384xf32>
      %cst_135 = arith.constant dense<0.000000e+00> : vector<4x384xf32>
      %133 = tpu.matmul %131, %132, %cst_135 {dimension_numbers = #tpu.dot_dimension_numbers<[1], [0], [0], [1], [0, 0, 1, 1], [], []>} : vector<4x8xf32>, vector<8x384xf32>, vector<4x384xf32> -> vector<4x384xf32>
      %134 = arith.addf %130, %133 : vector<4x384xf32>
      %135 = vector.broadcast %5 : vector<1x384xf32> to vector<4x384xf32>
      %136 = arith.mulf %134, %135 : vector<4x384xf32>
      %137 = arith.mulf %136, %136 : vector<4x384xf32>
      %138 = vector.shape_cast %137 : vector<4x384xf32> to vector<1x4x384xf32>
      %cst_136 = arith.constant dense<0.000000e+00> : vector<1xf32>
      %139 = vector.multi_reduction <add>, %138, %cst_136 [1, 2] : vector<1x4x384xf32> to vector<1xf32>
      %140 = vector.shape_cast %139 : vector<1xf32> to vector<1x1x1xf32>
      %141 = vector.extract %140[0, 0, 0] : f32 from vector<1x1x1xf32>
      %cst_137 = arith.constant 1.000000e-24 : f32
      %142 = arith.maximumf %141, %cst_137 : f32
      %143 = math.rsqrt %142 : f32
      %144 = vector.broadcast %143 : f32 to vector<4x384xf32>
      %145 = arith.mulf %136, %144 : vector<4x384xf32>
      %c0_138 = arith.constant 0 : index
      %c128_139 = arith.constant 128 : index
      %146 = vector.load %arg9[%c0_138, %c128_139] : memref<4x559xf32, #tpu.memory_space<vmem>>, vector<4x384xf32>
      tpu.vector_store %arg9[%c0_138, %c128_139], %145 {strides = array<i32>} : memref<4x559xf32, #tpu.memory_space<vmem>>, vector<4x384xf32>,
    }
    %c0_11 = arith.constant 0 : index
    %c0_12 = arith.constant 0 : index
    %7 = vector.load %arg1[%c0_11, %c0_12] : memref<8x36xf32, #tpu.memory_space<vmem>>, vector<8x4xf32>
    %c0_13 = arith.constant 0 : index
    %c103 = arith.constant 103 : index
    %8 = vector.load %arg9[%c0_13, %c103] : memref<4x559xf32, #tpu.memory_space<vmem>>, vector<4x384xf32>
    %cst = arith.constant dense<0.000000e+00> : vector<8x384xf32>
    %9 = tpu.matmul %7, %8, %cst {dimension_numbers = #tpu.dot_dimension_numbers<[1], [0], [0], [1], [0, 0, 1, 1], [], []>} : vector<8x4xf32>, vector<4x384xf32>, vector<8x384xf32> -> vector<8x384xf32>
    %c0_14 = arith.constant 0 : index
    %c4 = arith.constant 4 : index
    %10 = vector.load %arg1[%c0_14, %c4] : memref<8x36xf32, #tpu.memory_space<vmem>>, vector<8x4xf32>
    %c0_15 = arith.constant 0 : index
    %c104 = arith.constant 104 : index
    %11 = vector.load %arg9[%c0_15, %c104] : memref<4x559xf32, #tpu.memory_space<vmem>>, vector<4x384xf32>
    %cst_16 = arith.constant dense<0.000000e+00> : vector<8x384xf32>
    %12 = tpu.matmul %10, %11, %cst_16 {dimension_numbers = #tpu.dot_dimension_numbers<[1], [0], [0], [1], [0, 0, 1, 1], [], []>} : vector<8x4xf32>, vector<4x384xf32>, vector<8x384xf32> -> vector<8x384xf32>
    %13 = arith.addf %9, %12 : vector<8x384xf32>
    %c0_17 = arith.constant 0 : index
    %c8 = arith.constant 8 : index
    %14 = vector.load %arg1[%c0_17, %c8] : memref<8x36xf32, #tpu.memory_space<vmem>>, vector<8x4xf32>
    %c0_18 = arith.constant 0 : index
    %c105 = arith.constant 105 : index
    %15 = vector.load %arg9[%c0_18, %c105] : memref<4x559xf32, #tpu.memory_space<vmem>>, vector<4x384xf32>
    %cst_19 = arith.constant dense<0.000000e+00> : vector<8x384xf32>
    %16 = tpu.matmul %14, %15, %cst_19 {dimension_numbers = #tpu.dot_dimension_numbers<[1], [0], [0], [1], [0, 0, 1, 1], [], []>} : vector<8x4xf32>, vector<4x384xf32>, vector<8x384xf32> -> vector<8x384xf32>
    %17 = arith.addf %13, %16 : vector<8x384xf32>
    %c0_20 = arith.constant 0 : index
    %c12 = arith.constant 12 : index
    %18 = vector.load %arg1[%c0_20, %c12] : memref<8x36xf32, #tpu.memory_space<vmem>>, vector<8x4xf32>
    %c0_21 = arith.constant 0 : index
    %c127 = arith.constant 127 : index
    %19 = vector.load %arg9[%c0_21, %c127] : memref<4x559xf32, #tpu.memory_space<vmem>>, vector<4x384xf32>
    %cst_22 = arith.constant dense<0.000000e+00> : vector<8x384xf32>
    %20 = tpu.matmul %18, %19, %cst_22 {dimension_numbers = #tpu.dot_dimension_numbers<[1], [0], [0], [1], [0, 0, 1, 1], [], []>} : vector<8x4xf32>, vector<4x384xf32>, vector<8x384xf32> -> vector<8x384xf32>
    %21 = arith.addf %17, %20 : vector<8x384xf32>
    %c0_23 = arith.constant 0 : index
    %c16 = arith.constant 16 : index
    %22 = vector.load %arg1[%c0_23, %c16] : memref<8x36xf32, #tpu.memory_space<vmem>>, vector<8x4xf32>
    %c0_24 = arith.constant 0 : index
    %c128 = arith.constant 128 : index
    %23 = vector.load %arg9[%c0_24, %c128] : memref<4x559xf32, #tpu.memory_space<vmem>>, vector<4x384xf32>
    %cst_25 = arith.constant dense<0.000000e+00> : vector<8x384xf32>
    %24 = tpu.matmul %22, %23, %cst_25 {dimension_numbers = #tpu.dot_dimension_numbers<[1], [0], [0], [1], [0, 0, 1, 1], [], []>} : vector<8x4xf32>, vector<4x384xf32>, vector<8x384xf32> -> vector<8x384xf32>
    %25 = arith.addf %21, %24 : vector<8x384xf32>
    %c0_26 = arith.constant 0 : index
    %c20 = arith.constant 20 : index
    %26 = vector.load %arg1[%c0_26, %c20] : memref<8x36xf32, #tpu.memory_space<vmem>>, vector<8x4xf32>
    %c0_27 = arith.constant 0 : index
    %c129 = arith.constant 129 : index
    %27 = vector.load %arg9[%c0_27, %c129] : memref<4x559xf32, #tpu.memory_space<vmem>>, vector<4x384xf32>
    %cst_28 = arith.constant dense<0.000000e+00> : vector<8x384xf32>
    %28 = tpu.matmul %26, %27, %cst_28 {dimension_numbers = #tpu.dot_dimension_numbers<[1], [0], [0], [1], [0, 0, 1, 1], [], []>} : vector<8x4xf32>, vector<4x384xf32>, vector<8x384xf32> -> vector<8x384xf32>
    %29 = arith.addf %25, %28 : vector<8x384xf32>
    %c0_29 = arith.constant 0 : index
    %c24 = arith.constant 24 : index
    %30 = vector.load %arg1[%c0_29, %c24] : memref<8x36xf32, #tpu.memory_space<vmem>>, vector<8x4xf32>
    %c0_30 = arith.constant 0 : index
    %c151 = arith.constant 151 : index
    %31 = vector.load %arg9[%c0_30, %c151] : memref<4x559xf32, #tpu.memory_space<vmem>>, vector<4x384xf32>
    %cst_31 = arith.constant dense<0.000000e+00> : vector<8x384xf32>
    %32 = tpu.matmul %30, %31, %cst_31 {dimension_numbers = #tpu.dot_dimension_numbers<[1], [0], [0], [1], [0, 0, 1, 1], [], []>} : vector<8x4xf32>, vector<4x384xf32>, vector<8x384xf32> -> vector<8x384xf32>
    %33 = arith.addf %29, %32 : vector<8x384xf32>
    %c0_32 = arith.constant 0 : index
    %c28 = arith.constant 28 : index
    %34 = vector.load %arg1[%c0_32, %c28] : memref<8x36xf32, #tpu.memory_space<vmem>>, vector<8x4xf32>
    %c0_33 = arith.constant 0 : index
    %c152 = arith.constant 152 : index
    %35 = vector.load %arg9[%c0_33, %c152] : memref<4x559xf32, #tpu.memory_space<vmem>>, vector<4x384xf32>
    %cst_34 = arith.constant dense<0.000000e+00> : vector<8x384xf32>
    %36 = tpu.matmul %34, %35, %cst_34 {dimension_numbers = #tpu.dot_dimension_numbers<[1], [0], [0], [1], [0, 0, 1, 1], [], []>} : vector<8x4xf32>, vector<4x384xf32>, vector<8x384xf32> -> vector<8x384xf32>
    %37 = arith.addf %33, %36 : vector<8x384xf32>
    %c0_35 = arith.constant 0 : index
    %c32 = arith.constant 32 : index
    %38 = vector.load %arg1[%c0_35, %c32] : memref<8x36xf32, #tpu.memory_space<vmem>>, vector<8x4xf32>
    %c0_36 = arith.constant 0 : index
    %c153 = arith.constant 153 : index
    %39 = vector.load %arg9[%c0_36, %c153] : memref<4x559xf32, #tpu.memory_space<vmem>>, vector<4x384xf32>
    %cst_37 = arith.constant dense<0.000000e+00> : vector<8x384xf32>
    %40 = tpu.matmul %38, %39, %cst_37 {dimension_numbers = #tpu.dot_dimension_numbers<[1], [0], [0], [1], [0, 0, 1, 1], [], []>} : vector<8x4xf32>, vector<4x384xf32>, vector<8x384xf32> -> vector<8x384xf32>
    %41 = arith.addf %37, %40 : vector<8x384xf32>
    %c0_38 = arith.constant 0 : index
    %c128_39 = arith.constant 128 : index
    %42 = vector.load %arg8[%c0_38, %c128_39] : memref<8x559xf32, #tpu.memory_space<vmem>>, vector<8x384xf32>
    %43 = arith.mulf %42, %41 : vector<8x384xf32>
    %44 = vector.shape_cast %43 : vector<8x384xf32> to vector<1x8x384xf32>
    %cst_40 = arith.constant dense<0.000000e+00> : vector<1xf32>
    %45 = vector.multi_reduction <add>, %44, %cst_40 [1, 2] : vector<1x8x384xf32> to vector<1xf32>
    %46 = vector.shape_cast %45 : vector<1xf32> to vector<1x1x1xf32>
    %47 = vector.extract %46[0, 0, 0] : f32 from vector<1x1x1xf32>
    %c0_41 = arith.constant 0 : index
    %c0_42 = arith.constant 0 : index
    %48 = vector.load %arg7[%c0_41, %c0_42] : memref<8x36xf32, #tpu.memory_space<vmem>>, vector<8x36xf32>
    %cst_43 = arith.constant 1.000000e+00 : f32
    %49 = arith.divf %cst_43, %47 : f32
    %50 = vector.broadcast %49 : f32 to vector<8x36xf32>
    %51 = arith.mulf %48, %50 : vector<8x36xf32>
    %c0_44 = arith.constant 0 : index
    %c0_45 = arith.constant 0 : index
    %52 = vector.load %arg10[%c0_44, %c0_45] : memref<8x36xf32, #tpu.memory_space<vmem>>, vector<8x36xf32>
    tpu.vector_store %arg10[%c0_44, %c0_45], %51 {strides = array<i32>} : memref<8x36xf32, #tpu.memory_space<vmem>>, vector<8x36xf32>,
    return
  }
  func.func @transform_0(%arg0: i32) -> (i32, i32) {
    %c0_i32 = arith.constant 0 : i32
    %c0_i32_0 = arith.constant 0 : i32
    %c0_i32_1 = arith.constant 0 : i32
    return %c0_i32, %c0_i32_0 : i32, i32
  }
  func.func @transform_1(%arg0: i32) -> (i32, i32) {
    %c0_i32 = arith.constant 0 : i32
    %c0_i32_0 = arith.constant 0 : i32
    %c0_i32_1 = arith.constant 0 : i32
    return %c0_i32, %c0_i32_0 : i32, i32
  }
  func.func @transform_2(%arg0: i32) -> (i32, i32) {
    %c0_i32 = arith.constant 0 : i32
    %c0_i32_0 = arith.constant 0 : i32
    %c0_i32_1 = arith.constant 0 : i32
    return %c0_i32, %c0_i32_0 : i32, i32
  }
  func.func @transform_3(%arg0: i32) -> (i32, i32) {
    %c0_i32 = arith.constant 0 : i32
    %c0_i32_0 = arith.constant 0 : i32
    %c0_i32_1 = arith.constant 0 : i32
    return %c0_i32, %c0_i32_0 : i32, i32
  }
  func.func @transform_4(%arg0: i32) -> (i32, i32) {
    %c0_i32 = arith.constant 0 : i32
    %c0_i32_0 = arith.constant 0 : i32
    %c0_i32_1 = arith.constant 0 : i32
    return %c0_i32, %c0_i32_0 : i32, i32
  }
  func.func @transform_5(%arg0: i32) -> (i32, i32) {
    %c0_i32 = arith.constant 0 : i32
    %c0_i32_0 = arith.constant 0 : i32
    %c0_i32_1 = arith.constant 0 : i32
    return %c0_i32, %c0_i32_0 : i32, i32
  }
  func.func @transform_6(%arg0: i32) -> (i32, i32) {
    %c0_i32 = arith.constant 0 : i32
    %c0_i32_0 = arith.constant 0 : i32
    %c0_i32_1 = arith.constant 0 : i32
    return %c0_i32, %c0_i32_0 : i32, i32
  }
  func.func @transform_7(%arg0: i32) -> (i32, i32) {
    %c0_i32 = arith.constant 0 : i32
    %c0_i32_0 = arith.constant 0 : i32
    %c0_i32_1 = arith.constant 0 : i32
    return %c0_i32, %c0_i32_0 : i32, i32
  }
  func.func @transform_8(%arg0: i32) -> (i32, i32) {
    %c0_i32 = arith.constant 0 : i32
    %c0_i32_0 = arith.constant 0 : i32
    %c0_i32_1 = arith.constant 0 : i32
    return %c0_i32, %c0_i32_0 : i32, i32
  }
  func.func @transform_9(%arg0: i32) -> (i32, i32) {
    %c0_i32 = arith.constant 0 : i32
    %c0_i32_0 = arith.constant 0 : i32
    %c0_i32_1 = arith.constant 0 : i32
    return %c0_i32, %c0_i32_0 : i32, i32
  }
}

</mosaic_0001>

<bundles_post_ra>
// kernel: _run_power_method.1
= control target key start
LH: loop header
LB: loop body
LE: loop exit
PB: predicated region body
PF: predicated region fallthrough
CT: control target
= control target key end

     0   :  { %15 = vsyncpa [#allocation3], 0  ;;  %s5976_s0 = inlined_call_operand.vmem [shape: f32[8,36], index: 0, kind: input, shape index: {}]   ;;  %s5977_s1 = inlined_call_operand.vmem [shape: f32[4,72], index: 1, kind: input, shape index: {}]   ;;  %s5978_s2 = inlined_call_operand.vmem [shape: f32[8,559], index: 2, kind: input, shape index: {}]   ;;  %s5979_s3 = inlined_call_operand.vmem [shape: f32[4,559], index: 3, kind: input, shape index: {}]   ;;  %s5980_s4 = inlined_call_operand.vmem [shape: f32[1,384], index: 4, kind: input, shape index: {}, may-alias: {4,5}]   ;;  %s5981_s5 = inlined_call_operand.vmem [shape: f32[1,384], index: 5, kind: input, shape index: {}, may-alias: {4,5}]   ;;  %s5982_s6 = inlined_call_operand.vmem [shape: f32[8,36], index: 6, kind: input, shape index: {}]   ;;  %s5983_s7 = inlined_call_operand.hbm [shape: f32[8,559], index: 7, kind: output, shape index: {0}]   ;;  %s5984_s8 = inlined_call_operand.hbm [shape: f32[4,559], index: 8, kind: output, shape index: {1}]   ;;  %s5985_s9 = inlined_call_operand.hbm [shape: f32[8,36], index: 9, kind: output, shape index: {2}]  }
   0x1   :  { %16 = vsyncpa [#allocation5], 0  ;;  %v31_v0 = vld [vmem:[%s5978_s2] sm:$0xff]  ;;  %v32_v1 = vld [vmem:[%s5978_s2 + $0x8] sm:$0xff]  ;;  %vm40_vm0 = vcmask 384000   ;;  %vm47_vm1 = vcmask 379904  }
   0x2   :  { %36 = vst [vmem:[#allocation2] sm:$0xff] %v31_v0  ;;  %37 = vst [vmem:[#allocation2 + $0x8] sm:$0xff] %v32_v1  ;;  %v33_v2 = vld [vmem:[%s5978_s2 + $0x10] sm:$0xff]  ;;  %v34_v3 = vld [vmem:[%s5978_s2 + $0x18] sm:$0xff]  ;;  %s5428_s28 = smov 0  }
   0x3   :  { %v35_v4 = vld [vmem:[%s5978_s2 + $0x20] sm:$0xff]  ;;  %38 = vst [vmem:[#allocation2 + $0x10] sm:$0xff] %v33_v2  ;;  %39 = vst [vmem:[#allocation2 + $0x18] sm:$0xff] %v34_v3  ;;  %v43_v6 = vld [vmem:[%s5979_s3 + $0x8] sm:$0xff] }
   0x4   :  { %41 = vst.msk [vmem:[#allocation2 + $0x20] sm:$0xff] %vm40_vm0, %v35_v4  ;;  %v42_v5 = vld [vmem:[%s5979_s3] sm:$0xff]  ;;  %v44_v7 = vld [vmem:[%s5979_s3 + $0x10] sm:$0xf]  ;;  %46 = vst [vmem:[#allocation4 + $0x8] sm:$0xff] %v43_v6 }
   0x5   :  { %45 = vst [vmem:[#allocation4] sm:$0xff] %v42_v5  ;;  %48 = vst.msk [vmem:[#allocation4 + $0x10] sm:$0xf] %vm47_vm1, %v44_v7  ;;  %v5421_v8 = vld [vmem:[%s5980_s4] sm:$0x7] }
   0x6   :  { %v5426_v9 = vld [vmem:[%s5981_s5] sm:$0x7] }
   0x7 LB: > { %s5302_s3 = smov 24   ;;  %v5437_v12 = vld [vmem:[%s5976_s0] sm:$0xff]  ;;  %v5303_v13 = vmov 0.0   ;;  %vm5304_vm2 = vmmov 0   ;;  %s5305_s5 = smov 124   ;;  %vm75_vm3 = vcmask 195584   ;;  %s5300_s28 = sphi %s5428_s28, %s56_s28  }
   0x8   : > { %153 = vmatprep.mubr.f32.mxu0 %v5303_v13  ;;  %4917 = vmatprep.subr.mxu1 %v5303_v13  ;;  %s5306_s30 = smov 25   ;;  %s5307_s10 = smov 23   ;;  %vm82_vm4 = vcmask 1043456   ;;  %vm79_vm5 = vcmask 31744   ;;  %vm238_vm6 = vcmask 203776   ;;  %vm409_vm7 = vcmask 187392  }
   0x9   : > { %4919 = vmatprep.mubr.msk.f32.mxu1 %vm5304_vm2, %v5303_v13  ;;  %s5308_s11 = smov 120   ;;  %s5309_s12 = smov 1   ;;  %vm583_vm8 = vcmask 7168   ;;  %vm918_vm9 = vcmask 1039360   ;;  %vm1092_vm10 = vcmask 859136   ;;  %vm1266_vm11 = vcmask 850944  }
   0xa   : > { %s5310_s13 = smov 116   ;;  %s5311_s14 = smov 112   ;;  %vm1440_vm12 = vcmask 842752   ;;  %vm1666_vm13 = vcmask 64512  }
   0xb   : > { %v59_v14 = vld [vmem:[#allocation4 + $0x8] sm:$0xff]  ;;  %s5312_s15 = smov 127   ;;  %s5313_s16 = smov 108  }
   0xc   : > { %v58_v10 = vld [vmem:[#allocation4] sm:$0xff]  ;;  %v66_v15 = vcombine.high %v59_v14, %v59_v14  ;;  %v902_v17 = vld [vmem:[#allocation4 + $0xc] sm:$0xff]  ;;  %s5314_s17 = smov 105   ;;  %s5315_s18 = smov 104  }
   0xd   : > { %67 = vrot.lane.b32.xlu1 %v58_v10, %s5302_s3  ;;  %v65_v11 = vcombine.high %v58_v10, %v58_v10  ;;  %v5461_v16 = vld [vmem:[#allocation4 + $0x4] sm:$0xff]  ;;  %v909_v19 = vcombine.high %v902_v17, %v902_v17  ;;  %s5316_s19 = smov 100   ;;  %s5317_s20 = smov 103   ;;  %v741_v52 = vld [vmem:[#allocation4 + $0xc] sm:$0xf] }
   0xe   : > { %v5468_v18 = vcombine.high %v5461_v16, %v5461_v16  ;;  %s5318_s21 = smov 96   ;;  %s5319_s25 = smov 1e-24  }
   0xf   : > { %69 = vrot.lane.b32.xlu0 %v65_v11, %s5302_s3  ;;  %s5320_s27 = smov 88   ;;  %s5322_s29 = smov 80  }
  0x10   : > { %s5323_s4 = smov 64   ;;  %s56_s28 = sadd.s32 1, %s5300_s28  }
  0x11   : > { %61 = vrot.lane.b32.xlu1 %v5437_v12, %s5305_s5  ;;  %p53_p0 = scmp.ge.s32.totalorder %s56_s28, 100  }
  0x12   :  { %vm5326_vm14 = vmmov (%p53_p0), 0   ;;  %s5328_s28 = smov (%p53_p0), 25   ;;  %s5338_s22 = smov (%p53_p0), 100  }
  0x13   : > { %71 = vrot.lane.b32.xlu0 %v59_v14, %s5302_s3  ;;  %s5339_s23 = smov (%p53_p0), 103  }
  0x15   : > { %232 = vrot.lane.b32.xlu1 %v65_v11, %s5306_s30 }
  0x17   : > { %73 = vrot.lane.b32.xlu0 %v66_v15, %s5302_s3 }
  0x19   : > { %230 = vrot.lane.b32.xlu1 %v58_v10, %s5306_s30 }
  0x1b   : > { %234 = vrot.lane.b32.xlu0 %v59_v14, %s5306_s30 }
  0x1d   : > { %403 = vrot.lane.b32.xlu1 %v65_v11, %s5307_s10 }
  0x1f   : > { %236 = vrot.lane.b32.xlu0 %v66_v15, %s5306_s30 }
  0x21   : > { %401 = vrot.lane.b32.xlu1 %v58_v10, %s5307_s10 }
  0x23   : > { %405 = vrot.lane.b32.xlu0 %v59_v14, %s5307_s10 }
  0x25   : > { %407 = vrot.lane.b32.xlu1 %v66_v15, %s5307_s10 }
  0x27   : > { %395 = vrot.lane.b32.xlu0 %v5437_v12, %s5308_s11 }
  0x29   : > { %579 = vrot.lane.b32.xlu1 %v59_v14, %s5309_s12 }
  0x2b   : > { %577 = vrot.lane.b32.xlu0 %v65_v11, %s5309_s12 }
  0x2d   : > { %569 = vrot.lane.b32.xlu1 %v5437_v12, %s5310_s13 }
  0x2f   : > { %575 = vrot.lane.b32.xlu0 %v58_v10, %s5309_s12 }
  0x31   : > { %743 = vrot.lane.b32.xlu1 %v5437_v12, %s5311_s14 }
  0x33   : > { %581 = vrot.lane.b32.xlu0 %v66_v15, %s5309_s12 }
  0x35   : > { %914 = vrot.lane.b32.xlu1 %v902_v17, %s5312_s15 }
  0x37   : > { %912 = vrot.lane.b32.xlu0 %v5468_v18, %s5312_s15 }
  0x39   : > { %904 = vrot.lane.b32.xlu1 %v5437_v12, %s5313_s16  ;;  %s5332_s16 = smov (%p53_p0), 116  }
  0x3b   : > { %910 = vrot.lane.b32.xlu0 %v5461_v16, %s5312_s15 }
  0x3d   : > { %1086 = vrot.lane.b32.xlu1 %v5468_v18, %s5314_s17 }
  0x3f   : > { %916 = vrot.lane.b32.xlu0 %v909_v19, %s5312_s15 }
  0x41   : > { %1084 = vrot.lane.b32.xlu1 %v5461_v16, %s5314_s17 }
  0x43   : > { %1088 = vrot.lane.b32.xlu0 %v902_v17, %s5314_s17 }
  0x45   : > { %1090 = vrot.lane.b32.xlu1 %v909_v19, %s5314_s17 }
  0x47   : > { %1078 = vrot.lane.b32.xlu0 %v5437_v12, %s5315_s18 }
  0x49   : > { %1262 = vrot.lane.b32.xlu1 %v902_v17, %s5315_s18 }
  0x4b   : > { %1260 = vrot.lane.b32.xlu0 %v5468_v18, %s5315_s18 }
  0x4d   : > { %1252 = vrot.lane.b32.xlu1 %v5437_v12, %s5316_s19  ;;  %s5335_s19 = smov (%p53_p0), 108  }
  0x4f   : > { %1258 = vrot.lane.b32.xlu0 %v5461_v16, %s5315_s18 }
  0x51   : > { %1434 = vrot.lane.b32.xlu1 %v5468_v18, %s5317_s20 }
  0x53   : > { %1264 = vrot.lane.b32.xlu0 %v909_v19, %s5315_s18 }
  0x55   : > { %1432 = vrot.lane.b32.xlu1 %v5461_v16, %s5317_s20 }
  0x57   : > { %1436 = vrot.lane.b32.xlu0 %v902_v17, %s5317_s20 }
  0x59   : > { %1438 = vrot.lane.b32.xlu1 %v909_v19, %s5317_s20 }
  0x5b   : > { %1426 = vrot.lane.b32.xlu0 %v5437_v12, %s5318_s21 }
  0x7f   : > { %v68_v20 = vpop.permute.xlu1 %67 }
  0x81   : > { %v70_v21 = vpop.permute.xlu0 %69 }
  0x82   : > { %v76_v26 = vsel %vm75_vm3, %v68_v20, %v70_v21 }
  0x83   : > { %v62_v22 = vpop.permute.xlu1 %61 }
  0x85   : > { %v72_v23 = vpop.permute.xlu0 %71 }
  0x86   : > { %v77_v24 = vsel %vm75_vm3, %v70_v21, %v72_v23 }
  0x87   : > { %4755 = vmatprep.subr.msk.mxu0 %vm82_vm4, %v77_v24  ;;  %v233_v25 = vpop.permute.xlu1 %232  ;;  %v1597_v24 = vlaneseq }
  0x88   : > { %4756 = vmatpush1.msk.msra.mxu0 %vm82_vm4, %v76_v26 }
  0x89   : > { %v74_v27 = vpop.permute.xlu0 %73  ;;  %4757 = vmatmul.mubr.msk.f32.vlgmr.msra.gmra.mrb[0].mxu0 %vm79_vm5, %v62_v22 }
  0x8a   : > { %v78_v28 = vsel %vm75_vm3, %v72_v23, %v74_v27  ;;  %314 = vmatprep.mubr.f32.mxu0 %v5303_v13 }
  0x8b   : > { %4918 = vmatpush3.msk.msra.mxu1 %vm82_vm4, %v78_v28  ;;  %v231_v29 = vpop.permute.xlu1 %230 }
  0x8c   : > { %4920 = vmatmul.mubr.msk.f32.vlgmr.msra.gmra.mrb[0].mxu1 %vm79_vm5, %v62_v22  ;;  %4922 = vmatprep.subr.mxu1 %v5303_v13  ;;  %v239_v32 = vsel %vm238_vm6, %v231_v29, %v233_v25 }
  0x8d   : > { %v235_v30 = vpop.permute.xlu0 %234  ;;  %4924 = vmatprep.mubr.msk.f32.mxu1 %vm5304_vm2, %v5303_v13 }
  0x8e   : > { %v240_v31 = vsel %vm238_vm6, %v233_v25, %v235_v30  ;;  %v5609_v25 = vshrl.u32 %v1597_v24, 7 }
  0x8f   : > { %4760 = vmatprep.subr.msk.mxu0 %vm82_vm4, %v240_v31  ;;  %v404_v33 = vpop.permute.xlu1 %403 }
  0x90   : > { %4761 = vmatpush1.msk.msra.mxu0 %vm82_vm4, %v239_v32  ;;  %v1599_v26 = vsub.s32 0, %v5609_v25  ;;  %v1603_v27 = vsub.s32 1, %v5609_v25  ;;  %v1607_v28 = vsub.s32 2, %v5609_v25 }
  0x91   : > { %v237_v34 = vpop.permute.xlu0 %236  ;;  %4762 = vmatmul.mubr.msk.f32.vlgmr.msra.gmra.mrb[0].mxu0 %vm79_vm5, %v5437_v12 }
  0x92   : > { %v241_v35 = vsel %vm238_vm6, %v235_v30, %v237_v34  ;;  %485 = vmatprep.mubr.f32.mxu0 %v5303_v13  ;;  %v1600_v29 = vrot.slane %v5421_v8, %v1599_v26  ;;  %v1604_v30 = vrot.slane %v5421_v8, %v1603_v27  ;;  %v1608_v31 = vrot.slane %v5421_v8, %v1607_v28 }
  0x93   : > { %4923 = vmatpush3.msk.msra.mxu1 %vm82_vm4, %v241_v35  ;;  %v402_v36 = vpop.permute.xlu1 %401 }
  0x94   : > { %4925 = vmatmul.mubr.msk.f32.vlgmr.msra.gmra.mrb[0].mxu1 %vm79_vm5, %v5437_v12  ;;  %4927 = vmatprep.subr.mxu1 %v5303_v13  ;;  %v410_v39 = vsel %vm409_vm7, %v402_v36, %v404_v33 }
  0x95   : > { %v406_v37 = vpop.permute.xlu0 %405  ;;  %4929 = vmatprep.mubr.msk.f32.mxu1 %vm5304_vm2, %v5303_v13 }
  0x96   : > { %v411_v38 = vsel %vm409_vm7, %v404_v33, %v406_v37 }
  0x97   : > { %4765 = vmatprep.subr.msk.mxu0 %vm82_vm4, %v411_v38  ;;  %v408_v40 = vpop.permute.xlu1 %407 }
  0x98   : > { %v412_v41 = vsel %vm409_vm7, %v406_v37, %v408_v40  ;;  %4766 = vmatpush1.msk.msra.mxu0 %vm82_vm4, %v410_v39 }
  0x99   : > { %v396_v42 = vpop.permute.xlu0 %395  ;;  %4928 = vmatpush3.msk.msra.mxu1 %vm82_vm4, %v412_v41 }
  0x9a   : > { %4767 = vmatmul.mubr.msk.f32.vlgmr.msra.gmra.mrb[0].mxu0 %vm79_vm5, %v396_v42  ;;  %4932 = vmatprep.subr.mxu1 %v5303_v13 }
  0x9b   : > { %v580_v43 = vpop.permute.xlu1 %579  ;;  %659 = vmatprep.mubr.f32.mxu0 %v5303_v13 }
  0x9c   : > { %4930 = vmatmul.mubr.msk.f32.vlgmr.msra.gmra.mrb[0].mxu1 %vm79_vm5, %v396_v42 }
  0x9d   : > { %v578_v44 = vpop.permute.xlu0 %577  ;;  %4934 = vmatprep.mubr.msk.f32.mxu1 %vm5304_vm2, %v5303_v13 }
  0x9e   : > { %v585_v45 = vsel %vm583_vm8, %v578_v44, %v580_v43 }
  0x9f   : > { %4770 = vmatprep.subr.msk.mxu0 %vm82_vm4, %v585_v45  ;;  %v570_v46 = vpop.permute.xlu1 %569  ;;  %v5627_v45 = vld [vmem:[%s5977_s1] sm:$0xf]  ;;  %s5327_s1 = smov (%p53_p0), 124  }
  0xa1   : > { %v576_v47 = vpop.permute.xlu0 %575 }
  0xa2   : > { %v584_v48 = vsel %vm583_vm8, %v576_v47, %v578_v44  ;;  %v1641_v44 = vld [vmem:[#allocation2] sm:$0xff] }
  0xa3   : > { %4771 = vmatpush1.msk.msra.mxu0 %vm82_vm4, %v584_v48  ;;  %v744_v49 = vpop.permute.xlu1 %743  ;;  %1652 = vrot.lane.b32.xlu1 %v1641_v44, %s5302_s3 }
  0xa4   : > { %4772 = vmatmul.mubr.msk.f32.vlgmr.msra.gmra.mrb[0].mxu0 %vm79_vm5, %v570_v46  ;;  %4775 = vmatprep.subr.msk.mxu0 %vm82_vm4, %v5468_v18 }
  0xa5   : > { %v582_v50 = vpop.permute.xlu0 %581  ;;  %4776 = vmatpush1.msk.msra.mxu0 %vm82_vm4, %v5461_v16  ;;  %820 = vmatprep.mubr.f32.mxu0 %v5303_v13 }
  0xa6   : > { %v586_v51 = vsel %vm583_vm8, %v580_v43, %v582_v50 }
  0xa7   : > { %4933 = vmatpush3.msk.msra.mxu1 %vm82_vm4, %v586_v51  ;;  %v915_v53 = vpop.permute.xlu1 %914  ;;  %1646 = vrot.lane.b32.xlu1 %v5627_v45, %s5308_s11  ;;  %s5324_s11 = smov (%p53_p0), 24  }
  0xa8   : > { %4935 = vmatmul.mubr.msk.f32.vlgmr.msra.gmra.mrb[0].mxu1 %vm79_vm5, %v570_v46  ;;  %4937 = vmatprep.subr.mxu1 %v5303_v13 }
  0xa9   : > { %v913_v54 = vpop.permute.xlu0 %912  ;;  %4938 = vmatpush3.msk.msra.mxu1 %vm82_vm4, %v741_v52  ;;  %4939 = vmatprep.mubr.msk.f32.mxu1 %vm5304_vm2, %v5303_v13 }
  0xaa   : > { %v920_v55 = vsel %vm918_vm9, %v913_v54, %v915_v53  ;;  %4942 = vmatprep.subr.mxu1 %v5303_v13 }
  0xab   : > { %4780 = vmatprep.subr.msk.mxu0 %vm82_vm4, %v920_v55  ;;  %v905_v56 = vpop.permute.xlu1 %904  ;;  %1810 = vrot.lane.b32.xlu1 %v1641_v44, %s5306_s30 }
  0xac   : > { %4777 = vmatmul.mubr.msk.f32.vlgmr.msra.gmra.mrb[0].mxu0 %vm79_vm5, %v744_v49 }
  0xad   : > { %v911_v57 = vpop.permute.xlu0 %910  ;;  %994 = vmatprep.mubr.f32.mxu0 %v5303_v13 }
  0xae   : > { %v919_v58 = vsel %vm918_vm9, %v911_v57, %v913_v54 }
  0xaf   : > { %4781 = vmatpush1.msk.msra.mxu0 %vm82_vm4, %v919_v58  ;;  %v1087_v59 = vpop.permute.xlu1 %1086 }
  0xb0   : > { %4940 = vmatmul.mubr.msk.f32.vlgmr.msra.gmra.mrb[0].mxu1 %vm79_vm5, %v744_v49 }
  0xb1   : > { %v917_v60 = vpop.permute.xlu0 %916  ;;  %4944 = vmatprep.mubr.msk.f32.mxu1 %vm5304_vm2, %v5303_v13 }
  0xb2   : > { %v921_v61 = vsel %vm918_vm9, %v915_v53, %v917_v60 }
  0xb3   : > { %4943 = vmatpush3.msk.msra.mxu1 %vm82_vm4, %v921_v61  ;;  %v1085_v62 = vpop.permute.xlu1 %1084 }
  0xb4   : > { %4782 = vmatmul.mubr.msk.f32.vlgmr.msra.gmra.mrb[0].mxu0 %vm79_vm5, %v905_v56  ;;  %4947 = vmatprep.subr.mxu1 %v5303_v13  ;;  %v1093_v1 = vsel %vm1092_vm10, %v1085_v62, %v1087_v59 }
  0xb5   : > { %v1089_v63 = vpop.permute.xlu0 %1088  ;;  %1168 = vmatprep.mubr.f32.mxu0 %v5303_v13 }
  0xb6   : > { %v1094_v0 = vsel %vm1092_vm10, %v1087_v59, %v1089_v63  ;;  %v2442_v59 = vld [vmem:[#allocation2 + $0x20] sm:$0xff] }
  0xb7   : > { %4785 = vmatprep.subr.msk.mxu0 %vm82_vm4, %v1094_v0  ;;  %v1091_v2 = vpop.permute.xlu1 %1090 }
  0xb8   : > { %v1095_v3 = vsel %vm1092_vm10, %v1089_v63, %v1091_v2  ;;  %4945 = vmatmul.mubr.msk.f32.vlgmr.msra.gmra.mrb[0].mxu1 %vm79_vm5, %v905_v56  ;;  %4786 = vmatpush1.msk.msra.mxu0 %vm82_vm4, %v1093_v1 }
  0xb9   : > { %v1079_v4 = vpop.permute.xlu0 %1078  ;;  %4948 = vmatpush3.msk.msra.mxu1 %vm82_vm4, %v1095_v3  ;;  %4949 = vmatprep.mubr.msk.f32.mxu1 %vm5304_vm2, %v5303_v13 }
  0xba   : > { %4952 = vmatprep.subr.mxu1 %v5303_v13 }
  0xbb   : > { %v1263_v5 = vpop.permute.xlu1 %1262 }
  0xbc   : > { %4787 = vmatmul.mubr.msk.f32.vlgmr.msra.gmra.mrb[0].mxu0 %vm79_vm5, %v1079_v4 }
  0xbd   : > { %v1261_v6 = vpop.permute.xlu0 %1260  ;;  %1342 = vmatprep.mubr.f32.mxu0 %v5303_v13 }
  0xbe   : > { %v1268_v7 = vsel %vm1266_vm11, %v1261_v6, %v1263_v5 }
  0xbf   : > { %4790 = vmatprep.subr.msk.mxu0 %vm82_vm4, %v1268_v7  ;;  %v1253_v10 = vpop.permute.xlu1 %1252 }
  0xc0   : > { %4950 = vmatmul.mubr.msk.f32.vlgmr.msra.gmra.mrb[0].mxu1 %vm79_vm5, %v1079_v4 }
  0xc1   : > { %v1259_v11 = vpop.permute.xlu0 %1258  ;;  %4954 = vmatprep.mubr.msk.f32.mxu1 %vm5304_vm2, %v5303_v13 }
  0xc2   : > { %v1267_v12 = vsel %vm1266_vm11, %v1259_v11, %v1261_v6 }
  0xc3   : > { %4791 = vmatpush1.msk.msra.mxu0 %vm82_vm4, %v1267_v12  ;;  %v1435_v14 = vpop.permute.xlu1 %1434 }
  0xc4   : > { %4792 = vmatmul.mubr.msk.f32.vlgmr.msra.gmra.mrb[0].mxu0 %vm79_vm5, %v1253_v10 }
  0xc5   : > { %v1265_v15 = vpop.permute.xlu0 %1264  ;;  %1516 = vmatprep.mubr.f32.mxu0 %v5303_v13 }
  0xc6   : > { %v1269_v16 = vsel %vm1266_vm11, %v1263_v5, %v1265_v15 }
  0xc7   : > { %4953 = vmatpush3.msk.msra.mxu1 %vm82_vm4, %v1269_v16  ;;  %v1433_v17 = vpop.permute.xlu1 %1432 }
  0xc8   : > { %4955 = vmatmul.mubr.msk.f32.vlgmr.msra.gmra.mrb[0].mxu1 %vm79_vm5, %v1253_v10  ;;  %4957 = vmatprep.subr.mxu1 %v5303_v13  ;;  %v1441_v20 = vsel %vm1440_vm12, %v1433_v17, %v1435_v14 }
  0xc9   : > { %v1437_v18 = vpop.permute.xlu0 %1436  ;;  %4959 = vmatprep.mubr.msk.f32.mxu1 %vm5304_vm2, %v5303_v13 }
  0xca   : > { %v1442_v19 = vsel %vm1440_vm12, %v1435_v14, %v1437_v18 }
  0xcb   : > { %4795 = vmatprep.subr.msk.mxu0 %vm82_vm4, %v1442_v19  ;;  %v1439_v21 = vpop.permute.xlu1 %1438 }
  0xcc   : > { %v1443_v22 = vsel %vm1440_vm12, %v1437_v18, %v1439_v21  ;;  %4796 = vmatpush1.msk.msra.mxu0 %vm82_vm4, %v1441_v20 }
  0xcd   : > { %v1427_v23 = vpop.permute.xlu0 %1426  ;;  %4958 = vmatpush3.msk.msra.mxu1 %vm82_vm4, %v1443_v22 }
  0xce   : > { %4797 = vmatmul.mubr.msk.f32.vlgmr.msra.gmra.mrb[0].mxu0 %vm79_vm5, %v1427_v23  ;;  %4962 = vmatprep.subr.mxu1 %v5303_v13 }
  0xcf   : > { %1733 = vmatprep.mubr.f32.mxu0 %v5303_v13 }
  0xd0   : > { %4960 = vmatmul.mubr.msk.f32.vlgmr.msra.gmra.mrb[0].mxu1 %vm79_vm5, %v1427_v23 }
  0xd1   : > { %4964 = vmatprep.mubr.msk.f32.mxu1 %vm5304_vm2, %v5303_v13 }
 0x115   : > { %v1653_v60 = vpop.permute.xlu1 %1652 }
 0x119   : > { %v1647_v61 = vpop.permute.xlu1 %1646 }
 0x11d   : > { %v1811_v62 = vpop.permute.xlu1 %1810 }
 0x1a1   : > { %v1518_v32 = vpop.f32.mrb[0].mxu0 }
 0x1a2   : > { %v1612_v33 = vmul.f32 %v1600_v29, %v1518_v32  ;;  %v1520_v34 = vpop.f32.mrb[1].mxu0 }
 0x1a3   : > { %v1613_v35 = vmul.f32 %v1604_v30, %v1520_v34  ;;  %v1589_v36 = vpop.f32.mrb[0].mxu1 }
 0x1a4   : > { %v1615_v37 = vmul.f32 %v1612_v33, %v1612_v33  ;;  %v1614_v38 = vmul.f32 %v1608_v31, %v1589_v36  ;;  %v4961_v39 = vpop.f32.mrb[1].mxu1 }
 0x1a5   : > { %v1616_v40 = vmul.f32 %v1613_v35, %v1613_v35 }
 0x1a6   : > { %v1617_v41 = vmul.f32 %v1614_v38, %v1614_v38 }
 0x1a7   : > { %v1618_v42 = vadd.f32 %v1616_v40, %v1615_v37 }
 0x1a9   : > { %v1619_v43 = vadd.f32 %v1618_v42, %v1617_v41 }
 0x1ab   : > { %1620 = vadd.xlane.f32.xlu0 %v1619_v43 }
 0x238   : > { %v1621_v46 = vpop.xlane.xlu0 %1620 }
 0x239   : > { %v1622_v47 = vrot.slane %v1621_v46, 4 }
 0x23b   : > { %v1623_v48 = vadd.f32 %v1622_v47, %v1621_v46 }
 0x23d   : > { %v1624_v49 = vrot.slane %v1623_v48, 2 }
 0x23f   : > { %v1625_v50 = vadd.f32 %v1624_v49, %v1623_v48 }
 0x241   : > { %v1626_v51 = vrot.slane %v1625_v50, 1 }
 0x243   : > { %v1627_v52 = vadd.f32 %v1626_v51, %v1625_v50 }
 0x245   : > { %5148 = vpush %v1627_v52 }
 0x276   : > { %s5149_s24 = spop %5148 }
 0x277   : > { %s1629_s2 = smax.f32 %s5319_s25, %s5149_s24  ;;  %s5340_s24 = smov (%p53_p0), 96  }
 0x278   : > { %v1630_v53 = vstv %s1629_s2 }
 0x279   : > { %5214 = vrsqrt.f32 %v1630_v53 }
 0x283   : > { %v5215_v54 = vpop.eup %5214 }
 0x284   : > { %5150 = vpush %v5215_v54 }
 0x2b5   : > { %s5151_s26 = spop %5150 }
 0x2b6   : > { %v1633_v55 = vstv %s5151_s26  ;;  %s5342_s26 = smov (%p53_p0), [#allocation2]  }
 0x2b7   : > { %v5633_v56 = vmul.f32 %v1633_v55, %v1612_v33  ;;  %v5635_v57 = vmul.f32 %v1633_v55, %v1613_v35  ;;  %v5637_v58 = vmul.f32 %v1633_v55, %v1614_v38 }
 0x2b9   : > { %1637 = vst [vmem:[#allocation2 + $0x8] sm:$0xff] %v5633_v56  ;;  %1638 = vst [vmem:[#allocation2 + $0x10] sm:$0xff] %v5635_v57  ;;  %1816 = vrot.lane.b32.xlu0 %v5637_v58, %s5306_s30  ;;  %1654 = vrot.lane.b32.xlu1 %v5633_v56, %s5302_s3 }
 0x2ba   : > { %1639 = vst [vmem:[#allocation2 + $0x18] sm:$0xff] %v5637_v58 }
 0x2bd   : > { %2129 = vrot.lane.b32.xlu0 %v5627_v45, %s5315_s18  ;;  %1656 = vrot.lane.b32.xlu1 %v5635_v57, %s5302_s3 }
 0x2c1   : > { %2135 = vrot.lane.b32.xlu0 %v5635_v57, %s5309_s12  ;;  %1658 = vrot.lane.b32.xlu1 %v5637_v58, %s5302_s3  ;;  %s5321_s3 = smov 72  }
 0x2c5   : > { %2291 = vrot.lane.b32.xlu0 %v5627_v45, %s5318_s21  ;;  %1812 = vrot.lane.b32.xlu1 %v5633_v56, %s5306_s30  ;;  %s5337_s21 = smov (%p53_p0), 104  }
 0x2c9   : > { %2443 = vrot.lane.b32.xlu0 %v5627_v45, %s5320_s27  ;;  %1814 = vrot.lane.b32.xlu1 %v5635_v57, %s5306_s30  ;;  %s4715_s27 = sshll.u32 (%p53_p0), %s5342_s26, 4  ;;  %s4716_s27 = int_to_ptr.vmem [resolvable:$true] %s4715_s27 }
 0x2cd   : > { %2453 = vrot.lane.b32.xlu0 %v5637_v58, %s5312_s15  ;;  %1969 = vrot.lane.b32.xlu1 %v1641_v44, %s5307_s10 }
 0x2d1   : > { %2617 = vrot.lane.b32.xlu0 %v2442_v59, %s5314_s17  ;;  %1967 = vrot.lane.b32.xlu1 %v5627_v45, %s5311_s14  ;;  %s5330_s14 = smov (%p53_p0), 120  }
 0x2d5   : > { %2613 = vrot.lane.b32.xlu0 %v5635_v57, %s5314_s17  ;;  %2131 = vrot.lane.b32.xlu1 %v1641_v44, %s5309_s12 }
 0x2d9   : > { %2611 = vrot.lane.b32.xlu0 %v5633_v56, %s5314_s17  ;;  %1971 = vrot.lane.b32.xlu1 %v5633_v56, %s5307_s10 }
 0x2dd   : > { %2771 = vrot.lane.b32.xlu0 %v5627_v45, %s5321_s3  ;;  %1973 = vrot.lane.b32.xlu1 %v5635_v57, %s5307_s10 }
 0x2e1   : > { %2777 = vrot.lane.b32.xlu0 %v5637_v58, %s5315_s18  ;;  %1975 = vrot.lane.b32.xlu1 %v5637_v58, %s5307_s10 }
 0x2e5   : > { %2937 = vrot.lane.b32.xlu0 %v5635_v57, %s5317_s20  ;;  %2133 = vrot.lane.b32.xlu1 %v5633_v56, %s5309_s12 }
 0x2e9   : > { %2935 = vrot.lane.b32.xlu0 %v5633_v56, %s5317_s20  ;;  %2137 = vrot.lane.b32.xlu1 %v5637_v58, %s5309_s12 }
 0x2ed   : > { %2455 = vrot.lane.b32.xlu1 %v2442_v59, %s5312_s15  ;;  %2941 = vrot.lane.b32.xlu0 %v2442_v59, %s5317_s20 }
 0x2f1   : > { %2451 = vrot.lane.b32.xlu1 %v5635_v57, %s5312_s15 }
 0x2f5   : > { %2449 = vrot.lane.b32.xlu1 %v5633_v56, %s5312_s15  ;;  %s5331_s15 = smov (%p53_p0), 1  }
 0x2f9   : > { %2609 = vrot.lane.b32.xlu1 %v5627_v45, %s5322_s29 }
 0x2fd   : > { %2615 = vrot.lane.b32.xlu1 %v5637_v58, %s5314_s17  ;;  %s5333_s17 = smov (%p53_p0), 112  }
 0x301   : > { %2775 = vrot.lane.b32.xlu1 %v5635_v57, %s5315_s18 }
 0x305   : > { %2773 = vrot.lane.b32.xlu1 %v5633_v56, %s5315_s18 }
 0x309   : > { %2779 = vrot.lane.b32.xlu1 %v2442_v59, %s5315_s18  ;;  %s5334_s18 = smov (%p53_p0), 127  }
 0x30d   : > { %2939 = vrot.lane.b32.xlu1 %v5637_v58, %s5317_s20  ;;  %s5336_s20 = smov (%p53_p0), 105  }
 0x311   : > { %2933 = vrot.lane.b32.xlu1 %v5627_v45, %s5323_s4 }
 0x32b   : > { %v1655_v63 = vpop.permute.xlu1 %1654  ;;  %v1817_v2 = vpop.permute.xlu0 %1816 }
 0x32c   : > { %v1660_v3 = vsel %vm75_vm3, %v1653_v60, %v1655_v63 }
 0x32f   : > { %v1657_v0 = vpop.permute.xlu1 %1656  ;;  %v2130_v6 = vpop.permute.xlu0 %2129 }
 0x330   : > { %v1661_v1 = vsel %vm75_vm3, %v1655_v63, %v1657_v0 }
 0x331   : > { %1669 = vmatprep.subr.mxu0 %v1661_v1 }
 0x332   : > { %1670 = vmatpush1.msra.mxu0 %v1660_v3  ;;  %v3099_v3 = vrot.slane %v5426_v9, %v1599_v26 }
 0x333   : > { %4800 = vmatmul.mubr.msk.f32.vlgmr.msra.gmra.mrb[2].mxu0 %vm1666_vm13, %v1647_v61  ;;  %v1659_v4 = vpop.permute.xlu1 %1658  ;;  %v2136_v14 = vpop.permute.xlu0 %2135 }
 0x334   : > { %v1662_v5 = vsel %vm75_vm3, %v1657_v0, %v1659_v4  ;;  %1890 = vmatprep.mubr.f32.mxu0 %v5303_v13  ;;  %v3107_v4 = vrot.slane %v5426_v9, %v1607_v28 }
 0x335   : > { %4963 = vmatpush3.msra.mxu1 %v1662_v5 }
 0x336   : > { %4965 = vmatmul.mubr.msk.f32.vlgmr.msra.gmra.mrb[2].mxu1 %vm1666_vm13, %v1647_v61  ;;  %4967 = vmatprep.subr.mxu1 %v5303_v13 }
 0x337   : > { %v1813_v7 = vpop.permute.xlu1 %1812  ;;  %4969 = vmatprep.mubr.msk.f32.mxu1 %vm5304_vm2, %v5303_v13  ;;  %v2292_v17 = vpop.permute.xlu0 %2291 }
 0x338   : > { %v1818_v15 = vsel %vm238_vm6, %v1811_v62, %v1813_v7 }
 0x33b   : > { %v1815_v10 = vpop.permute.xlu1 %1814  ;;  %v2444_v20 = vpop.permute.xlu0 %2443 }
 0x33c   : > { %v1820_v11 = vsel %vm238_vm6, %v1815_v10, %v1817_v2  ;;  %v1819_v12 = vsel %vm238_vm6, %v1813_v7, %v1815_v10 }
 0x33d   : > { %1826 = vmatprep.subr.mxu0 %v1819_v12  ;;  %4968 = vmatpush3.msra.mxu1 %v1820_v11 }
 0x33e   : > { %1827 = vmatpush1.msra.mxu0 %v1818_v15  ;;  %4970 = vmatmul.mubr.msk.f32.vlgmr.msra.gmra.mrb[2].mxu1 %vm1666_vm13, %v5627_v45 }
 0x33f   : > { %v1970_v16 = vpop.permute.xlu1 %1969  ;;  %4802 = vmatmul.mubr.msk.f32.vlgmr.msra.gmra.mrb[2].mxu0 %vm1666_vm13, %v5627_v45  ;;  %4972 = vmatprep.subr.mxu1 %v5303_v13  ;;  %v2454_v22 = vpop.permute.xlu0 %2453 }
 0x340   : > { %2049 = vmatprep.mubr.f32.mxu0 %v5303_v13  ;;  %4974 = vmatprep.mubr.msk.f32.mxu1 %vm5304_vm2, %v5303_v13 }
 0x343   : > { %v1968_v18 = vpop.permute.xlu1 %1967  ;;  %v2618_v32 = vpop.permute.xlu0 %2617 }
 0x347   : > { %v2132_v19 = vpop.permute.xlu1 %2131  ;;  %v2614_v36 = vpop.permute.xlu0 %2613 }
 0x34b   : > { %v1972_v21 = vpop.permute.xlu1 %1971  ;;  %v2612_v40 = vpop.permute.xlu0 %2611 }
 0x34c   : > { %v1977_v29 = vsel %vm409_vm7, %v1970_v16, %v1972_v21  ;;  %v2619_v52 = vsel %vm1092_vm10, %v2612_v40, %v2614_v36  ;;  %v5805_v40 = vld [vmem:[%s5976_s0] sm:$0xff] (%p53_p0)  ;;  %s5329_s0 = smov (%p53_p0), 23  }
 0x34f   : > { %v1974_v23 = vpop.permute.xlu1 %1973  ;;  %v2772_v44 = vpop.permute.xlu0 %2771 }
 0x350   : > { %v1978_v24 = vsel %vm409_vm7, %v1972_v21, %v1974_v23 }
 0x351   : > { %1985 = vmatprep.subr.mxu0 %v1978_v24 }
 0x352   : > { %1986 = vmatpush1.msra.mxu0 %v1977_v29 }
 0x353   : > { %4804 = vmatmul.mubr.msk.f32.vlgmr.msra.gmra.mrb[2].mxu0 %vm1666_vm13, %v1968_v18  ;;  %v1976_v30 = vpop.permute.xlu1 %1975  ;;  %v2778_v48 = vpop.permute.xlu0 %2777 }
 0x354   : > { %v1979_v31 = vsel %vm409_vm7, %v1974_v23, %v1976_v30  ;;  %2211 = vmatprep.mubr.f32.mxu0 %v5303_v13 }
 0x355   : > { %4973 = vmatpush3.msra.mxu1 %v1979_v31 }
 0x356   : > { %4975 = vmatmul.mubr.msk.f32.vlgmr.msra.gmra.mrb[2].mxu1 %vm1666_vm13, %v1968_v18  ;;  %4977 = vmatprep.subr.mxu1 %v5303_v13 }
 0x357   : > { %v2134_v33 = vpop.permute.xlu1 %2133  ;;  %4979 = vmatprep.mubr.msk.f32.mxu1 %vm5304_vm2, %v5303_v13  ;;  %v2938_v53 = vpop.permute.xlu0 %2937 }
 0x358   : > { %v2139_v34 = vsel %vm583_vm8, %v2132_v19, %v2134_v33  ;;  %v2140_v35 = vsel %vm583_vm8, %v2134_v33, %v2136_v14 }
 0x359   : > { %2147 = vmatprep.subr.mxu0 %v2140_v35 }
 0x35a   : > { %2148 = vmatpush1.msra.mxu0 %v2139_v34 }
 0x35b   : > { %4806 = vmatmul.mubr.msk.f32.vlgmr.msra.gmra.mrb[2].mxu0 %vm1666_vm13, %v2130_v6  ;;  %2295 = vmatprep.subr.mxu0 %v5635_v57  ;;  %v2138_v37 = vpop.permute.xlu1 %2137 }
 0x35c   : > { %v2141_v38 = vsel %vm583_vm8, %v2136_v14, %v2138_v37  ;;  %2296 = vmatpush1.msra.mxu0 %v5633_v56  ;;  %2359 = vmatprep.mubr.f32.mxu0 %v5303_v13 }
 0x35d   : > { %4978 = vmatpush3.msra.mxu1 %v2141_v38 }
 0x35e   : > { %4980 = vmatmul.mubr.msk.f32.vlgmr.msra.gmra.mrb[2].mxu1 %vm1666_vm13, %v2130_v6  ;;  %4982 = vmatprep.subr.mxu1 %v5303_v13 }
 0x35f   : > { %4983 = vmatpush3.msra.mxu1 %v5637_v58  ;;  %v2456_v39 = vpop.permute.xlu1 %2455  ;;  %4984 = vmatprep.mubr.msk.f32.mxu1 %vm5304_vm2, %v5303_v13  ;;  %v2936_v58 = vpop.permute.xlu0 %2935 }
 0x360   : > { %4987 = vmatprep.subr.mxu1 %v5303_v13  ;;  %v2459_v43 = vsel %vm918_vm9, %v2454_v22, %v2456_v39  ;;  %v2943_v1 = vsel %vm1440_vm12, %v2936_v58, %v2938_v53  ;;  %v5325_v39 = vmov (%p53_p0), 0.0  }
 0x363   : > { %4808 = vmatmul.mubr.msk.f32.vlgmr.msra.gmra.mrb[2].mxu0 %vm1666_vm13, %v2292_v17  ;;  %v2452_v41 = vpop.permute.xlu1 %2451  ;;  %v2942_v61 = vpop.permute.xlu0 %2941 }
 0x364   : > { %v2458_v42 = vsel %vm918_vm9, %v2452_v41, %v2454_v22  ;;  %2529 = vmatprep.mubr.f32.mxu0 %v5303_v13 }
 0x365   : > { %2465 = vmatprep.subr.mxu0 %v2458_v42 }
 0x366   : > { %4985 = vmatmul.mubr.msk.f32.vlgmr.msra.gmra.mrb[2].mxu1 %vm1666_vm13, %v2292_v17 }
 0x367   : > { %4988 = vmatpush3.msra.mxu1 %v2459_v43  ;;  %v2450_v45 = vpop.permute.xlu1 %2449  ;;  %4989 = vmatprep.mubr.msk.f32.mxu1 %vm5304_vm2, %v5303_v13 }
 0x368   : > { %v2457_v46 = vsel %vm918_vm9, %v2450_v45, %v2452_v41  ;;  %4992 = vmatprep.subr.mxu1 %v5303_v13 }
 0x369   : > { %2466 = vmatpush1.msra.mxu0 %v2457_v46 }
 0x36b   : > { %4810 = vmatmul.mubr.msk.f32.vlgmr.msra.gmra.mrb[2].mxu0 %vm1666_vm13, %v2444_v20  ;;  %v2610_v47 = vpop.permute.xlu1 %2609 }
 0x36c   : > { %2691 = vmatprep.mubr.f32.mxu0 %v5303_v13 }
 0x36e   : > { %4990 = vmatmul.mubr.msk.f32.vlgmr.msra.gmra.mrb[2].mxu1 %vm1666_vm13, %v2444_v20 }
 0x36f   : > { %v2616_v49 = vpop.permute.xlu1 %2615  ;;  %4994 = vmatprep.mubr.msk.f32.mxu1 %vm5304_vm2, %v5303_v13 }
 0x370   : > { %v2621_v50 = vsel %vm1092_vm10, %v2616_v49, %v2618_v32  ;;  %v2620_v51 = vsel %vm1092_vm10, %v2614_v36, %v2616_v49 }
 0x371   : > { %2627 = vmatprep.subr.mxu0 %v2620_v51  ;;  %4993 = vmatpush3.msra.mxu1 %v2621_v50 }
 0x372   : > { %2628 = vmatpush1.msra.mxu0 %v2619_v52  ;;  %4997 = vmatprep.subr.mxu1 %v5303_v13 }
 0x373   : > { %4812 = vmatmul.mubr.msk.f32.vlgmr.msra.gmra.mrb[2].mxu0 %vm1666_vm13, %v2610_v47  ;;  %v2776_v54 = vpop.permute.xlu1 %2775 }
 0x374   : > { %v2782_v55 = vsel %vm1266_vm11, %v2776_v54, %v2778_v48  ;;  %2853 = vmatprep.mubr.f32.mxu0 %v5303_v13 }
 0x375   : > { %2789 = vmatprep.subr.mxu0 %v2782_v55 }
 0x376   : > { %4995 = vmatmul.mubr.msk.f32.vlgmr.msra.gmra.mrb[2].mxu1 %vm1666_vm13, %v2610_v47 }
 0x377   : > { %v2774_v56 = vpop.permute.xlu1 %2773  ;;  %4999 = vmatprep.mubr.msk.f32.mxu1 %vm5304_vm2, %v5303_v13 }
 0x378   : > { %v2781_v57 = vsel %vm1266_vm11, %v2774_v56, %v2776_v54 }
 0x379   : > { %2790 = vmatpush1.msra.mxu0 %v2781_v57 }
 0x37b   : > { %4814 = vmatmul.mubr.msk.f32.vlgmr.msra.gmra.mrb[2].mxu0 %vm1666_vm13, %v2772_v44  ;;  %v2780_v59 = vpop.permute.xlu1 %2779 }
 0x37c   : > { %v2783_v60 = vsel %vm1266_vm11, %v2778_v48, %v2780_v59  ;;  %3015 = vmatprep.mubr.f32.mxu0 %v5303_v13 }
 0x37d   : > { %4998 = vmatpush3.msra.mxu1 %v2783_v60 }
 0x37e   : > { %5000 = vmatmul.mubr.msk.f32.vlgmr.msra.gmra.mrb[2].mxu1 %vm1666_vm13, %v2772_v44  ;;  %5002 = vmatprep.subr.mxu1 %v5303_v13 }
 0x37f   : > { %v2940_v62 = vpop.permute.xlu1 %2939  ;;  %5004 = vmatprep.mubr.msk.f32.mxu1 %vm5304_vm2, %v5303_v13  ;;  %v3103_v13 = vrot.slane %v5426_v9, %v1603_v27 }
 0x380   : > { %v2945_v63 = vsel %vm1440_vm12, %v2940_v62, %v2942_v61  ;;  %v2944_v0 = vsel %vm1440_vm12, %v2938_v53, %v2940_v62 }
 0x381   : > { %2951 = vmatprep.subr.mxu0 %v2944_v0  ;;  %5003 = vmatpush3.msra.mxu1 %v2945_v63 }
 0x382   : > { %2952 = vmatpush1.msra.mxu0 %v2943_v1  ;;  %5007 = vmatprep.subr.mxu1 (%p53_p0), %v5325_v39 }
 0x383   : > { %v2934_v2 = vpop.permute.xlu1 %2933 }
 0x384   : > { %4816 = vmatmul.mubr.msk.f32.vlgmr.msra.gmra.mrb[2].mxu0 %vm1666_vm13, %v2934_v2 }
 0x385   :  { %3241 = vmatprep.mubr.f32.mxu0 (%p53_p0), %v5325_v39 }
 0x386   : > { %5005 = vmatmul.mubr.msk.f32.vlgmr.msra.gmra.mrb[2].mxu1 %vm1666_vm13, %v2934_v2 }
 0x387   :  { %5009 = vmatprep.mubr.msk.f32.mxu1 (%p53_p0), %vm5326_vm14, %v5325_v39 }
 0x457   : > { %v3017_v5 = vpop.f32.mrb[2].mxu0 }
 0x458   : > { %v3111_v6 = vmul.f32 %v3099_v3, %v3017_v5  ;;  %v3019_v7 = vpop.f32.mrb[3].mxu0 }
 0x459   : > { %v3112_v10 = vmul.f32 %v3103_v13, %v3019_v7  ;;  %v3088_v11 = vpop.f32.mrb[2].mxu1 }
 0x45a   : > { %v3114_v12 = vmul.f32 %v3111_v6, %v3111_v6  ;;  %v3113_v14 = vmul.f32 %v3107_v4, %v3088_v11  ;;  %v5006_v15 = vpop.f32.mrb[3].mxu1 }
 0x45b   : > { %v3115_v16 = vmul.f32 %v3112_v10, %v3112_v10 }
 0x45c   : > { %v3116_v17 = vmul.f32 %v3113_v14, %v3113_v14  ;;  %v3117_v26 = vsel %vm82_vm4, %v3114_v12, 0.0 }
 0x45d   : > { %v3118_v18 = vsel %vm82_vm4, %v3115_v16, 0.0 }
 0x45e   : > { %v3119_v19 = vadd.f32 %v3118_v18, %v3117_v26  ;;  %v3120_v27 = vsel %vm82_vm4, %v3116_v17, 0.0 }
 0x460   : > { %v3121_v25 = vadd.f32 %v3120_v27, %v3119_v19 }
 0x462   : > { %3122 = vadd.xlane.f32.xlu1 %v3121_v25 }
 0x4ef   : > { %v3123_v28 = vpop.xlane.xlu1 %3122 }
 0x4f0   : > { %v3124_v20 = vrot.slane %v3123_v28, 4 }
 0x4f2   : > { %v3125_v21 = vadd.f32 %v3124_v20, %v3123_v28 }
 0x4f4   : > { %v3126_v22 = vrot.slane %v3125_v21, 2 }
 0x4f6   : > { %v3127_v23 = vadd.f32 %v3126_v22, %v3125_v21 }
 0x4f8   : > { %v3128_v24 = vrot.slane %v3127_v23, 1 }
 0x4fa   : > { %v3129_v29 = vadd.f32 %v3128_v24, %v3127_v23 }
 0x4fc   : > { %5152 = vpush %v3129_v29 }
 0x52d   : > { %s5153_s5 = spop %5152 }
 0x52e   : > { %s3131_s30 = smax.f32 %s5319_s25, %s5153_s5  ;;  %s5341_s25 = smov (%p53_p0), [#allocation4]  }
 0x52f   : > { %v3132_v30 = vstv %s3131_s30  ;;  %s4725_s2 = sshll.u32 (%p53_p0), %s5341_s25, 4  ;;  %s4726_s2 = int_to_ptr.vmem [resolvable:$true] %s4725_s2 }
 0x530   : > { %5216 = vrsqrt.f32 %v3132_v30  ;;  %s5224_s3 = scalar_lea.vmem (%p53_p0), %s4726_s2, 320  ;;  %p5229_p2 = scmp.lt.s32.totalorder (%p53_p0), %s4726_s2, %s4726_s2 }
 0x531   :  { %p5225_p1 = scmp.ne.s32.totalorder (%p53_p0), %s4726_s2, %s5224_s3  ;;  %p5230_p3 = scmp.lt.s32.totalorder (%p53_p0), %s5224_s3, %s5224_s3 }
 0x533   :  { %p5231_p4 = por (%p53_p0), %p5230_p3, %p5229_p2 }
 0x535   :  { %p5232_p5 = pnand (%p53_p0), %p5231_p4, %p5225_p1 }
 0x53a   : > { %v5217_v31 = vpop.eup %5216 }
 0x53b   : > { %5154 = vpush %v5217_v31 }
 0x56c   : > { %s5155_s10 = spop %5154  ;;  %55 = sbr.rel (!%p53_p0) target bundleno = 7 (0x7), region = 71 }
 0x56d   : > { %v3135_v32 = vstv %s5155_s10 }
 0x56e   : > { %v3136_v33 = vmul.f32 %v3135_v32, %v3111_v6  ;;  %v3137_v34 = vmul.f32 %v3135_v32, %v3112_v10  ;;  %v3138_v35 = vmul.f32 %v3135_v32, %v3113_v14 }
 0x570   : > { %v3141_v36 = vcombine.low %v3136_v33, %v3137_v34  ;;  %3144 = vst [vmem:[#allocation4 + $0xc] sm:$0xf] %v3138_v35 }
 0x572   : > { %3143 = vst [vmem:[#allocation4 + $0x4] sm:$0xff] %v3141_v36 }
 0x577   :  { %v3990_v42 = vld [vmem:[#allocation4 + $0xc] sm:$0xff] }
 0x578   :  { %v3997_v44 = vcombine.high %v3990_v42, %v3990_v42  ;;  %v3829_v15 = vld [vmem:[#allocation4 + $0xc] sm:$0xf] }
 0x579   :  { %v3146_v37 = vld [vmem:[#allocation4] sm:$0xff]  ;;  %v3147_v41 = vld [vmem:[#allocation4 + $0x8] sm:$0xff] }
 0x57a   :  { %3155 = vrot.lane.b32.xlu1 %v3146_v37, %s5324_s11  ;;  %v3153_v38 = vcombine.high %v3146_v37, %v3146_v37  ;;  %v3154_v8 = vcombine.high %v3147_v41, %v3147_v41  ;;  %v5813_v9 = vld [vmem:[#allocation4 + $0x4] sm:$0xff] }
 0x57b   :  { %v5818_v43 = vcombine.high %v5813_v9, %v5813_v9 }
 0x57c   :  { %3157 = vrot.lane.b32.xlu0 %v3153_v38, %s5324_s11 }
 0x57e   :  { %3149 = vrot.lane.b32.xlu1 %v5805_v40, %s5327_s1 }
 0x580   :  { %3159 = vrot.lane.b32.xlu0 %v3147_v41, %s5324_s11 }
 0x582   :  { %3320 = vrot.lane.b32.xlu1 %v3153_v38, %s5328_s28 }
 0x584   :  { %3161 = vrot.lane.b32.xlu0 %v3154_v8, %s5324_s11 }
 0x586   :  { %3318 = vrot.lane.b32.xlu1 %v3146_v37, %s5328_s28 }
 0x588   :  { %3322 = vrot.lane.b32.xlu0 %v3147_v41, %s5328_s28 }
 0x58a   :  { %3491 = vrot.lane.b32.xlu1 %v3153_v38, %s5329_s0 }
 0x58c   :  { %3324 = vrot.lane.b32.xlu0 %v3154_v8, %s5328_s28 }
 0x58e   :  { %3489 = vrot.lane.b32.xlu1 %v3146_v37, %s5329_s0 }
 0x590   :  { %3493 = vrot.lane.b32.xlu0 %v3147_v41, %s5329_s0 }
 0x592   :  { %3495 = vrot.lane.b32.xlu1 %v3154_v8, %s5329_s0 }
 0x594   :  { %3483 = vrot.lane.b32.xlu0 %v5805_v40, %s5330_s14 }
 0x596   :  { %3667 = vrot.lane.b32.xlu1 %v3147_v41, %s5331_s15 }
 0x598   :  { %3665 = vrot.lane.b32.xlu0 %v3153_v38, %s5331_s15 }
 0x59a   :  { %3657 = vrot.lane.b32.xlu1 %v5805_v40, %s5332_s16 }
 0x59c   :  { %3663 = vrot.lane.b32.xlu0 %v3146_v37, %s5331_s15 }
 0x59e   :  { %3831 = vrot.lane.b32.xlu1 %v5805_v40, %s5333_s17 }
 0x5a0   :  { %3669 = vrot.lane.b32.xlu0 %v3154_v8, %s5331_s15 }
 0x5a2   :  { %4002 = vrot.lane.b32.xlu1 %v3990_v42, %s5334_s18 }
 0x5a4   :  { %4000 = vrot.lane.b32.xlu0 %v5818_v43, %s5334_s18 }
 0x5a6   :  { %3992 = vrot.lane.b32.xlu1 %v5805_v40, %s5335_s19 }
 0x5a8   :  { %3998 = vrot.lane.b32.xlu0 %v5813_v9, %s5334_s18 }
 0x5aa   :  { %4174 = vrot.lane.b32.xlu1 %v5818_v43, %s5336_s20 }
 0x5ac   :  { %4004 = vrot.lane.b32.xlu0 %v3997_v44, %s5334_s18 }
 0x5ae   :  { %4172 = vrot.lane.b32.xlu1 %v5813_v9, %s5336_s20 }
 0x5b0   :  { %4176 = vrot.lane.b32.xlu0 %v3990_v42, %s5336_s20 }
 0x5b2   :  { %4178 = vrot.lane.b32.xlu1 %v3997_v44, %s5336_s20 }
 0x5b4   :  { %4166 = vrot.lane.b32.xlu0 %v5805_v40, %s5337_s21 }
 0x5b6   :  { %4350 = vrot.lane.b32.xlu1 %v3990_v42, %s5337_s21 }
 0x5b8   :  { %4348 = vrot.lane.b32.xlu0 %v5818_v43, %s5337_s21 }
 0x5ba   :  { %4340 = vrot.lane.b32.xlu1 %v5805_v40, %s5338_s22 }
 0x5bc   :  { %4346 = vrot.lane.b32.xlu0 %v5813_v9, %s5337_s21 }
 0x5be   :  { %4522 = vrot.lane.b32.xlu1 %v5818_v43, %s5339_s23 }
 0x5c0   :  { %4352 = vrot.lane.b32.xlu0 %v3997_v44, %s5337_s21 }
 0x5c2   :  { %4520 = vrot.lane.b32.xlu1 %v5813_v9, %s5339_s23 }
 0x5c4   :  { %4524 = vrot.lane.b32.xlu0 %v3990_v42, %s5339_s23 }
 0x5c6   :  { %4526 = vrot.lane.b32.xlu1 %v3997_v44, %s5339_s23 }
 0x5c8   :  { %4514 = vrot.lane.b32.xlu0 %v5805_v40, %s5340_s24 }
 0x5ec   :  { %v3156_v45 = vpop.permute.xlu1 %3155 }
 0x5ee   :  { %v3158_v46 = vpop.permute.xlu0 %3157 }
 0x5ef   :  { %v3164_v51 = vsel %vm75_vm3, %v3156_v45, %v3158_v46 }
 0x5f0   :  { %v3150_v47 = vpop.permute.xlu1 %3149 }
 0x5f2   :  { %v3160_v48 = vpop.permute.xlu0 %3159 }
 0x5f3   :  { %v3165_v49 = vsel %vm75_vm3, %v3158_v46, %v3160_v48 }
 0x5f4   :  { %4818 = vmatprep.subr.msk.mxu0 %vm82_vm4, %v3165_v49  ;;  %v3321_v50 = vpop.permute.xlu1 %3320  ;;  %v4686_v49 = vld [vmem:[#allocation2 + $0x18] sm:$0xff] }
 0x5f5   :  { %4819 = vmatpush1.msk.msra.mxu0 %vm82_vm4, %v3164_v51 }
 0x5f6   :  { %v3162_v52 = vpop.permute.xlu0 %3161  ;;  %4820 = vmatmul.mubr.msk.f32.vlgmr.msra.gmra.mrb[0].mxu0 %vm79_vm5, %v3150_v47 }
 0x5f7   :  { %v3166_v53 = vsel %vm75_vm3, %v3160_v48, %v3162_v52  ;;  %3402 = vmatprep.mubr.f32.mxu0 %v5325_v39 }
 0x5f8   :  { %5008 = vmatpush3.msk.msra.mxu1 %vm82_vm4, %v3166_v53  ;;  %v3319_v54 = vpop.permute.xlu1 %3318 }
 0x5f9   :  { %5010 = vmatmul.mubr.msk.f32.vlgmr.msra.gmra.mrb[0].mxu1 %vm79_vm5, %v3150_v47  ;;  %5012 = vmatprep.subr.mxu1 %v5325_v39  ;;  %v3327_v57 = vsel %vm238_vm6, %v3319_v54, %v3321_v50  ;;  %v4684_v47 = vld [vmem:[#allocation2 + $0x8] sm:$0xff] }
 0x5fa   :  { %v3323_v55 = vpop.permute.xlu0 %3322  ;;  %5014 = vmatprep.mubr.msk.f32.mxu1 %vm5326_vm14, %v5325_v39 }
 0x5fb   :  { %v3328_v56 = vsel %vm238_vm6, %v3321_v50, %v3323_v55 }
 0x5fc   :  { %4823 = vmatprep.subr.msk.mxu0 %vm82_vm4, %v3328_v56  ;;  %v3492_v58 = vpop.permute.xlu1 %3491 }
 0x5fd   :  { %4824 = vmatpush1.msk.msra.mxu0 %vm82_vm4, %v3327_v57 }
 0x5fe   :  { %v3325_v59 = vpop.permute.xlu0 %3324  ;;  %4825 = vmatmul.mubr.msk.f32.vlgmr.msra.gmra.mrb[0].mxu0 %vm79_vm5, %v5805_v40 }
 0x5ff   :  { %v3329_v60 = vsel %vm238_vm6, %v3323_v55, %v3325_v59  ;;  %3573 = vmatprep.mubr.f32.mxu0 %v5325_v39 }
 0x600   :  { %5013 = vmatpush3.msk.msra.mxu1 %vm82_vm4, %v3329_v60  ;;  %v3490_v61 = vpop.permute.xlu1 %3489 }
 0x601   :  { %5015 = vmatmul.mubr.msk.f32.vlgmr.msra.gmra.mrb[0].mxu1 %vm79_vm5, %v5805_v40  ;;  %5017 = vmatprep.subr.mxu1 %v5325_v39  ;;  %v3498_v0 = vsel %vm409_vm7, %v3490_v61, %v3492_v58 }
 0x602   :  { %v3494_v62 = vpop.permute.xlu0 %3493  ;;  %5019 = vmatprep.mubr.msk.f32.mxu1 %vm5326_vm14, %v5325_v39 }
 0x603   :  { %v3499_v63 = vsel %vm409_vm7, %v3492_v58, %v3494_v62 }
 0x604   :  { %4828 = vmatprep.subr.msk.mxu0 %vm82_vm4, %v3499_v63  ;;  %v3496_v1 = vpop.permute.xlu1 %3495 }
 0x605   :  { %v3500_v2 = vsel %vm409_vm7, %v3494_v62, %v3496_v1  ;;  %4829 = vmatpush1.msk.msra.mxu0 %vm82_vm4, %v3498_v0 }
 0x606   :  { %v3484_v3 = vpop.permute.xlu0 %3483  ;;  %5018 = vmatpush3.msk.msra.mxu1 %vm82_vm4, %v3500_v2 }
 0x607   :  { %4830 = vmatmul.mubr.msk.f32.vlgmr.msra.gmra.mrb[0].mxu0 %vm79_vm5, %v3484_v3  ;;  %5022 = vmatprep.subr.mxu1 %v5325_v39 }
 0x608   :  { %v3668_v13 = vpop.permute.xlu1 %3667  ;;  %3747 = vmatprep.mubr.f32.mxu0 %v5325_v39 }
 0x609   :  { %5020 = vmatmul.mubr.msk.f32.vlgmr.msra.gmra.mrb[0].mxu1 %vm79_vm5, %v3484_v3 }
 0x60a   :  { %v3666_v4 = vpop.permute.xlu0 %3665  ;;  %5024 = vmatprep.mubr.msk.f32.mxu1 %vm5326_vm14, %v5325_v39 }
 0x60b   :  { %v3673_v5 = vsel %vm583_vm8, %v3666_v4, %v3668_v13 }
 0x60c   :  { %4833 = vmatprep.subr.msk.mxu0 %vm82_vm4, %v3673_v5  ;;  %v3658_v6 = vpop.permute.xlu1 %3657 }
 0x60e   :  { %v3664_v7 = vpop.permute.xlu0 %3663 }
 0x60f   :  { %v3672_v10 = vsel %vm583_vm8, %v3664_v7, %v3666_v4 }
 0x610   :  { %4834 = vmatpush1.msk.msra.mxu0 %vm82_vm4, %v3672_v10  ;;  %v3832_v11 = vpop.permute.xlu1 %3831 }
 0x611   :  { %4835 = vmatmul.mubr.msk.f32.vlgmr.msra.gmra.mrb[0].mxu0 %vm79_vm5, %v3658_v6  ;;  %4838 = vmatprep.subr.msk.mxu0 %vm82_vm4, %v5818_v43 }
 0x612   :  { %v3670_v12 = vpop.permute.xlu0 %3669  ;;  %4839 = vmatpush1.msk.msra.mxu0 %vm82_vm4, %v5813_v9  ;;  %3908 = vmatprep.mubr.f32.mxu0 %v5325_v39 }
 0x613   :  { %v3674_v14 = vsel %vm583_vm8, %v3668_v13, %v3670_v12 }
 0x614   :  { %5023 = vmatpush3.msk.msra.mxu1 %vm82_vm4, %v3674_v14  ;;  %v4003_v16 = vpop.permute.xlu1 %4002 }
 0x615   :  { %5025 = vmatmul.mubr.msk.f32.vlgmr.msra.gmra.mrb[0].mxu1 %vm79_vm5, %v3658_v6  ;;  %5027 = vmatprep.subr.mxu1 %v5325_v39 }
 0x616   :  { %v4001_v17 = vpop.permute.xlu0 %4000  ;;  %5028 = vmatpush3.msk.msra.mxu1 %vm82_vm4, %v3829_v15  ;;  %5029 = vmatprep.mubr.msk.f32.mxu1 %vm5326_vm14, %v5325_v39 }
 0x617   :  { %v4008_v26 = vsel %vm918_vm9, %v4001_v17, %v4003_v16  ;;  %5032 = vmatprep.subr.mxu1 %v5325_v39 }
 0x618   :  { %4843 = vmatprep.subr.msk.mxu0 %vm82_vm4, %v4008_v26  ;;  %v3993_v18 = vpop.permute.xlu1 %3992 }
 0x619   :  { %4840 = vmatmul.mubr.msk.f32.vlgmr.msra.gmra.mrb[0].mxu0 %vm79_vm5, %v3832_v11 }
 0x61a   :  { %v3999_v19 = vpop.permute.xlu0 %3998  ;;  %4082 = vmatprep.mubr.f32.mxu0 %v5325_v39 }
 0x61b   :  { %v4007_v27 = vsel %vm918_vm9, %v3999_v19, %v4001_v17 }
 0x61c   :  { %4844 = vmatpush1.msk.msra.mxu0 %vm82_vm4, %v4007_v27  ;;  %v4175_v25 = vpop.permute.xlu1 %4174 }
 0x61d   :  { %5030 = vmatmul.mubr.msk.f32.vlgmr.msra.gmra.mrb[0].mxu1 %vm79_vm5, %v3832_v11 }
 0x61e   :  { %v4005_v28 = vpop.permute.xlu0 %4004  ;;  %5034 = vmatprep.mubr.msk.f32.mxu1 %vm5326_vm14, %v5325_v39 }
 0x61f   :  { %v4009_v20 = vsel %vm918_vm9, %v4003_v16, %v4005_v28 }
 0x620   :  { %5033 = vmatpush3.msk.msra.mxu1 %vm82_vm4, %v4009_v20  ;;  %v4173_v21 = vpop.permute.xlu1 %4172 }
 0x621   :  { %4845 = vmatmul.mubr.msk.f32.vlgmr.msra.gmra.mrb[0].mxu0 %vm79_vm5, %v3993_v18  ;;  %5037 = vmatprep.subr.mxu1 %v5325_v39  ;;  %v4181_v24 = vsel %vm1092_vm10, %v4173_v21, %v4175_v25 }
 0x622   :  { %v4177_v22 = vpop.permute.xlu0 %4176  ;;  %4256 = vmatprep.mubr.f32.mxu0 %v5325_v39 }
 0x623   :  { %v4182_v23 = vsel %vm1092_vm10, %v4175_v25, %v4177_v22 }
 0x624   :  { %4848 = vmatprep.subr.msk.mxu0 %vm82_vm4, %v4182_v23  ;;  %v4179_v29 = vpop.permute.xlu1 %4178 }
 0x625   :  { %v4183_v30 = vsel %vm1092_vm10, %v4177_v22, %v4179_v29  ;;  %5035 = vmatmul.mubr.msk.f32.vlgmr.msra.gmra.mrb[0].mxu1 %vm79_vm5, %v3993_v18  ;;  %4849 = vmatpush1.msk.msra.mxu0 %vm82_vm4, %v4181_v24 }
 0x626   :  { %v4167_v31 = vpop.permute.xlu0 %4166  ;;  %5038 = vmatpush3.msk.msra.mxu1 %vm82_vm4, %v4183_v30  ;;  %5039 = vmatprep.mubr.msk.f32.mxu1 %vm5326_vm14, %v5325_v39 }
 0x627   :  { %5042 = vmatprep.subr.mxu1 %v5325_v39 }
 0x628   :  { %v4351_v32 = vpop.permute.xlu1 %4350 }
 0x629   :  { %4850 = vmatmul.mubr.msk.f32.vlgmr.msra.gmra.mrb[0].mxu0 %vm79_vm5, %v4167_v31 }
 0x62a   :  { %v4349_v33 = vpop.permute.xlu0 %4348  ;;  %4430 = vmatprep.mubr.f32.mxu0 %v5325_v39 }
 0x62b   :  { %v4356_v34 = vsel %vm1266_vm11, %v4349_v33, %v4351_v32 }
 0x62c   :  { %4853 = vmatprep.subr.msk.mxu0 %vm82_vm4, %v4356_v34  ;;  %v4341_v35 = vpop.permute.xlu1 %4340 }
 0x62d   :  { %5040 = vmatmul.mubr.msk.f32.vlgmr.msra.gmra.mrb[0].mxu1 %vm79_vm5, %v4167_v31 }
 0x62e   :  { %v4347_v36 = vpop.permute.xlu0 %4346  ;;  %5044 = vmatprep.mubr.msk.f32.mxu1 %vm5326_vm14, %v5325_v39 }
 0x62f   :  { %v4355_v37 = vsel %vm1266_vm11, %v4347_v36, %v4349_v33 }
 0x630   :  { %4854 = vmatpush1.msk.msra.mxu0 %vm82_vm4, %v4355_v37  ;;  %v4523_v38 = vpop.permute.xlu1 %4522 }
 0x631   :  { %4855 = vmatmul.mubr.msk.f32.vlgmr.msra.gmra.mrb[0].mxu0 %vm79_vm5, %v4341_v35 }
 0x632   :  { %v4353_v40 = vpop.permute.xlu0 %4352  ;;  %4604 = vmatprep.mubr.f32.mxu0 %v5325_v39 }
 0x633   :  { %v4357_v41 = vsel %vm1266_vm11, %v4351_v32, %v4353_v40 }
 0x634   :  { %5043 = vmatpush3.msk.msra.mxu1 %vm82_vm4, %v4357_v41  ;;  %v4521_v8 = vpop.permute.xlu1 %4520 }
 0x635   :  { %5045 = vmatmul.mubr.msk.f32.vlgmr.msra.gmra.mrb[0].mxu1 %vm79_vm5, %v4341_v35  ;;  %5047 = vmatprep.subr.mxu1 %v5325_v39  ;;  %v4529_v43 = vsel %vm1440_vm12, %v4521_v8, %v4523_v38 }
 0x636   :  { %v4525_v9 = vpop.permute.xlu0 %4524  ;;  %5049 = vmatprep.mubr.msk.f32.mxu1 %vm5326_vm14, %v5325_v39  ;;  %v4685_v39 = vld [vmem:[#allocation2 + $0x10] sm:$0xff] }
 0x637   :  { %v4530_v42 = vsel %vm1440_vm12, %v4523_v38, %v4525_v9 }
 0x638   :  { %4858 = vmatprep.subr.msk.mxu0 %vm82_vm4, %v4530_v42  ;;  %v4527_v44 = vpop.permute.xlu1 %4526 }
 0x639   :  { %v4531_v45 = vsel %vm1440_vm12, %v4525_v9, %v4527_v44  ;;  %4859 = vmatpush1.msk.msra.mxu0 %vm82_vm4, %v4529_v43 }
 0x63a   :  { %v4515_v46 = vpop.permute.xlu0 %4514  ;;  %5048 = vmatpush3.msk.msra.mxu1 %vm82_vm4, %v4531_v45 }
 0x63b   :  { %4860 = vmatmul.mubr.msk.f32.vlgmr.msra.gmra.mrb[0].mxu0 %vm79_vm5, %v4515_v46 }
 0x63d   :  { %5050 = vmatmul.mubr.msk.f32.vlgmr.msra.gmra.mrb[0].mxu1 %vm79_vm5, %v4515_v46 }
 0x70e   :  { %v4606_v48 = vpop.f32.mrb[0].mxu0 }
 0x70f   :  { %v4687_v50 = vmul.f32 %v4684_v47, %v4606_v48  ;;  %v4608_v51 = vpop.f32.mrb[1].mxu0 }
 0x710   :  { %v4688_v52 = vmul.f32 %v4685_v39, %v4608_v51  ;;  %v4677_v53 = vpop.f32.mrb[0].mxu1 }
 0x711   :  { %v4689_v54 = vmul.f32 %v4686_v49, %v4677_v53  ;;  %v5051_v55 = vpop.f32.mrb[1].mxu1 }
 0x712   :  { %v4690_v56 = vadd.f32 %v4688_v52, %v4687_v50 }
 0x714   :  { %v4691_v57 = vadd.f32 %v4690_v56, %v4689_v54 }
 0x716   :  { %4692 = vadd.xlane.f32.xlu0 %v4691_v57 }
 0x7a3   :  { %v4693_v58 = vpop.xlane.xlu0 %4692 }
 0x7a4   :  { %5235 = shalt.err (!%p5232_p5)
}
 0x7a5   :  { %s5236_s5 = scalar_lea.hbm %s5984_s8, 320 }
 0x7a6   :  { %p5237_p6 = scmp.ne.s32.totalorder %s5984_s8, %s5236_s5  ;;  %p5240_p7 = scmp.lt.u32.totalorder %s5236_s5, %s5984_s8 }
 0x7a8   :  { %p5242_p8 = pnand %p5240_p7, %p5237_p6 }
 0x7aa   :  { %5245 = shalt.err (!%p5242_p8)
}
 0x7ab   :  { %4728 = dma.vmem_to_hbm [thread:$0]  %s4726_s2, 320, %s5984_s8, [#allocation5]   ;;  %v4694_v59 = vrot.slane %v4693_v58, 4 }
 0x7ac   :  { %s5246_s28 = scalar_lea.vmem %s4716_s27, 640  ;;  %p5251_p10 = scmp.lt.s32.totalorder %s4716_s27, %s4716_s27 }
 0x7ad   :  { %p5247_p9 = scmp.ne.s32.totalorder %s4716_s27, %s5246_s28  ;;  %p5252_p11 = scmp.lt.s32.totalorder %s5246_s28, %s5246_s28 }
 0x7af   :  { %p5253_p12 = por %p5252_p11, %p5251_p10 }
 0x7b1   :  { %p5254_p13 = pnand %p5253_p12, %p5247_p9 }
 0x7b3   :  { %5257 = shalt.err (!%p5254_p13)
}
 0x7b4   :  { %s5258_s15 = scalar_lea.hbm %s5983_s7, 640 }
 0x7b5   :  { %p5259_p0 = scmp.ne.s32.totalorder %s5983_s7, %s5258_s15  ;;  %p5262_p1 = scmp.lt.u32.totalorder %s5258_s15, %s5983_s7 }
 0x7b7   :  { %p5264_p2 = pnand %p5262_p1, %p5259_p0 }
 0x7b9   :  { %5267 = shalt.err (!%p5264_p2)
}
 0x7ba   :  { %4718 = dma.vmem_to_hbm [thread:$0]  %s4716_s27, 640, %s5983_s7, [#allocation3]   ;;  %v4695_v60 = vadd.f32 %v4694_v59, %v4693_v58  ;;  %v4701_v3 = vld [vmem:[%s5982_s6] sm:$0xff]  ;;  %vm4707_vm15 = vcmask 293888  }
 0x7bb   :  { %s5343_s24 = smov [#allocation6]  }
 0x7bc   :  { %v4696_v61 = vrot.slane %v4695_v60, 2  ;;  %s4735_s25 = sshll.u32 %s5343_s24, 4  ;;  %s4736_s25 = int_to_ptr.vmem [resolvable:$true] %s4735_s25 }
 0x7bd   :  { %s5268_s7 = scalar_lea.vmem %s4736_s25, 128  ;;  %p5273_p4 = scmp.lt.s32.totalorder %s4736_s25, %s4736_s25 }
 0x7be   :  { %v4697_v62 = vadd.f32 %v4696_v61, %v4695_v60  ;;  %p5269_p3 = scmp.ne.s32.totalorder %s4736_s25, %s5268_s7  ;;  %p5274_p5 = scmp.lt.s32.totalorder %s5268_s7, %s5268_s7 }
 0x7c0   :  { %v4698_v63 = vrot.slane %v4697_v62, 1  ;;  %p5275_p6 = por %p5274_p5, %p5273_p4 }
 0x7c2   :  { %v4699_v0 = vadd.f32 %v4698_v63, %v4697_v62  ;;  %p5276_p7 = pnand %p5275_p6, %p5269_p3 }
 0x7c4   :  { %5156 = vpush %v4699_v0 }
 0x7f5   :  { %s5157_s21 = spop %5156 }
 0x7f6   :  { %v4702_v1 = vstv %s5157_s21 }
 0x7f7   :  { %5222 = vrcp.f32 %v4702_v1 }
 0x801   :  { %v5223_v2 = vpop.eup %5222 }
 0x802   :  { %5158 = vpush %v5223_v2 }
 0x833   :  { %s5159_s2 = spop %5158 }
 0x834   :  { %v4705_v13 = vstv %s5159_s2 }
 0x835   :  { %v4706_v4 = vmul.f32 %v4705_v13, %v4701_v3 }
 0x837   :  { %4708 = vst.msk [vmem:[#allocation6] sm:$0xff] %vm4707_vm15, %v4706_v4 }
 0x838   :  { %5279 = shalt.err (!%p5276_p7)
}
 0x839   :  { %s5280_s3 = scalar_lea.hbm %s5985_s9, 128 }
 0x83a   :  { %p5281_p8 = scmp.ne.s32.totalorder %s5985_s9, %s5280_s3  ;;  %p5284_p9 = scmp.lt.u32.totalorder %s5280_s3, %s5985_s9 }
 0x83c   :  { %p5286_p10 = pnand %p5284_p9, %p5281_p8 }
 0x83e   :  { %5289 = shalt.err (!%p5286_p10)
}
 0x83f   :  { %4738 = dma.vmem_to_hbm [thread:$0]  %s4736_s25, 128, %s5985_s9, [#allocation5]  }
 0x840   :  { %5294 = dma.done.wait [#allocation3], 640  }
 0x841   :  { %5295 = vsyncadd [#allocation3], 4294966656 }
 0x842   :  { %5296 = dma.done.wait [#allocation5], 448  }
 0x843   :  { %5297 = vsyncadd [#allocation5], 4294966848 }
 0x844   :  { %4748 = vsyncpa [#allocation3], 1 }
 0x845   :  { %4749 = vsyncpa [#allocation5], 1 }

</bundles_post_ra>
